<compile_context>
chip_gen: v5e
topology: v5e:2x2
jax: 0.10.0
libtpu: 0.0.40
codegen_flags: <defaults>
</compile_context>

<pallas_src>
import jax
import jax.numpy as jnp
from jax.experimental import pallas as pl
from jax.experimental.pallas import tpu as pltpu


# ----------------------------- Pallas kernel --------------------------------

def make_encoder_kernel(num_layers, T, B, H):
    """Fused multi-layer LSTM kernel.

    Ref order: (x_flat, [w_ih_t, w_hh_t, bias] * num_layers,
                h_out, c_out, [hseq scratch iff num_layers > 1]).
    x_flat is the embedded sequence flattened time-major to (T*B, F).
    """

    def kernel(*refs):
        x_ref = refs[0]
        w_refs = refs[1:1 + 3 * num_layers]
        h_out_ref = refs[1 + 3 * num_layers]
        c_out_ref = refs[2 + 3 * num_layers]
        hseq_scr = refs[3 + 3 * num_layers] if num_layers > 1 else None

        seq = x_ref[...]                           # (T*B, F) current layer input
        for layer in range(num_layers):            # static: unrolled over layers
            w_ih_t = w_refs[3 * layer][...]        # (F, 4H)
            w_hh_t = w_refs[3 * layer + 1][...]    # (H, 4H)
            bias = w_refs[3 * layer + 2][...]      # (1, 4H)

            # Hoisted input projection: ONE (T*B, F) x (F, 4H) MXU matmul for
            # all timesteps (no recurrent dependence).
            gx = jnp.dot(seq, w_ih_t,
                         preferred_element_type=jnp.float32) + bias

            h = jnp.zeros((B, H), jnp.float32)
            c = jnp.zeros((B, H), jnp.float32)
            write_seq = layer < num_layers - 1

            # Sequential recurrence, fully unrolled (T small & static); h/c are
            # loop-carried values.  Only the (B,H)x(H,4H) matmul is serial.
            for t in range(T):
                gates = gx[t * B:(t + 1) * B, :] + jnp.dot(
                    h, w_hh_t, preferred_element_type=jnp.float32)
                i_g = jax.nn.sigmoid(gates[:, 0 * H:1 * H])
                f_g = jax.nn.sigmoid(gates[:, 1 * H:2 * H])
                g_g = jnp.tanh(gates[:, 2 * H:3 * H])
                o_g = jax.nn.sigmoid(gates[:, 3 * H:4 * H])
                c = f_g * c + i_g * g_g
                h = o_g * jnp.tanh(c)
                if write_seq:
                    # Inter-layer activation stays in VMEM (no HBM round trip).
                    hseq_scr[t * B:(t + 1) * B, :] = h

            # Final states stored exactly once per layer.
            h_out_ref[layer] = h
            c_out_ref[layer] = c
            if write_seq:
                seq = hseq_scr[...]                # (T*B, H) next layer input

    return kernel


def encoder_lstm_stack(emb_flat, lstm_params, T, B, H):
    """Run the fused LSTM stack. emb_flat: (T*B, E) f32, time-major rows."""
    num_layers = len(lstm_params)
    inputs = [emb_flat]
    for lyr in lstm_params:
        inputs += [lyr["w_ih_t"], lyr["w_hh_t"], lyr["bias"]]
    scratch = ([pltpu.VMEM((T * B, H), jnp.float32)]
               if num_layers > 1 else [])

    # No grid: the whole problem (inputs, weights, activations) fits VMEM at
    # these sizes, so default whole-array VMEM blocks are used and there is no
    # per-step pipeline overhead.  (At realistic T/B, chunk T and/or add a
    # "parallel" batch grid axis for v7x's second TensorCore.)
    h_out, c_out = pl.pallas_call(
        make_encoder_kernel(num_layers, T, B, H),
        out_shape=(jax.ShapeDtypeStruct((num_layers, B, H), jnp.float32),
                   jax.ShapeDtypeStruct((num_layers, B, H), jnp.float32)),
        scratch_shapes=scratch,
    )(*inputs)
    return h_out, c_out


# --------------------------- Encoder (glue in JAX) ---------------------------

def init_encoder_params(key, input_size, embedding_size, hidden_size,
                        num_layers):
    k_emb, key = jax.random.split(key)
    params = {
        "embedding": jax.random.normal(
            k_emb, (input_size, embedding_size), jnp.float32),
        "lstm": [],
    }
    bound = 1.0 / float(hidden_size) ** 0.5
    for layer in range(num_layers):
        in_f = embedding_size if layer == 0 else hidden_size
        key, k1, k2, k3, k4 = jax.random.split(key, 5)
        w_ih = jax.random.uniform(k1, (4 * hidden_size, in_f),
                                  jnp.float32, -bound, bound)
        w_hh = jax.random.uniform(k2, (4 * hidden_size, hidden_size),
                                  jnp.float32, -bound, bound)
        b_ih = jax.random.uniform(k3, (4 * hidden_size,),
                                  jnp.float32, -bound, bound)
        b_hh = jax.random.uniform(k4, (4 * hidden_size,),
                                  jnp.float32, -bound, bound)
        # Pre-transpose / fuse once (MXU-friendly (F,4H)/(H,4H) layout).
        params["lstm"].append(dict(
            w_ih_t=jnp.transpose(w_ih),
            w_hh_t=jnp.transpose(w_hh),
            bias=(b_ih + b_hh).reshape(1, 4 * hidden_size),
        ))
    return params


@jax.jit
def encoder_forward(params, x):
    """x: (T, B) int32 token ids -> (hidden_state, cell_state), each (L,B,H)."""
    T, B = x.shape
    emb = jnp.take(params["embedding"], x, axis=0)   # (T, B, E)
    # TODO(synk): nn.Dropout / inter-layer LSTM dropout are stochastic in
    # train mode; implemented here as identity (eval-mode semantics).
    E = emb.shape[-1]
    H = params["lstm"][0]["w_hh_t"].shape[0]
    emb_flat = emb.reshape(T * B, E)                 # time-major rows
    return encoder_lstm_stack(emb_flat, params["lstm"], T, B, H)


def encoder_forward_ref(params, x):
    """Pure-JAX reference (same math, no Pallas) for validation."""
    emb = jnp.take(params["embedding"], x, axis=0)
    T, B, _ = emb.shape
    H = params["lstm"][0]["w_hh_t"].shape[0]
    seq = emb
    hs, cs = [], []
    for lyr in params["lstm"]:
        h = jnp.zeros((B, H), jnp.float32)
        c = jnp.zeros((B, H), jnp.float32)
        outs = []
        for t in range(T):
            gates = seq[t] @ lyr["w_ih_t"] + lyr["bias"] + h @ lyr["w_hh_t"]
            i_g = jax.nn.sigmoid(gates[:, 0 * H:1 * H])
            f_g = jax.nn.sigmoid(gates[:, 1 * H:2 * H])
            g_g = jnp.tanh(gates[:, 2 * H:3 * H])
            o_g = jax.nn.sigmoid(gates[:, 3 * H:4 * H])
            c = f_g * c + i_g * g_g
            h = o_g * jnp.tanh(c)
            outs.append(h)
        seq = jnp.stack(outs, axis=0)
        hs.append(h)
        cs.append(c)
    return jnp.stack(hs, axis=0), jnp.stack(cs, axis=0)


# ---------------------------------- main -------------------------------------

if __name__ == "__main__":
    input_size = 50       # vocab size
    embedding_size = 32
    hidden_size = 32
    num_layers = 2
    p = 0.5               # dropout prob (identity in eval mode)

    seq_len = 8
    batch = 2

    key = jax.random.PRNGKey(0)
    k_params, k_x = jax.random.split(key)
    params = init_encoder_params(k_params, input_size, embedding_size,
                                 hidden_size, num_layers)
    x = jax.random.randint(k_x, (seq_len, batch), 0, input_size, jnp.int32)

    hidden_state, cell_state = encoder_forward(params, x)
    jax.block_until_ready((hidden_state, cell_state))

    assert hidden_state.shape == (num_layers, batch, hidden_size)
    assert cell_state.shape == (num_layers, batch, hidden_size)

    # Cross-check against the pure-JAX reference.
    h_ref, c_ref = encoder_forward_ref(params, x)
    assert bool(jnp.allclose(hidden_state, h_ref, atol=2e-3, rtol=2e-2))
    assert bool(jnp.allclose(cell_state, c_ref, atol=2e-3, rtol=2e-2))

    print("KERNEL_OK")
</pallas_src>

<mosaic_0001>
module attributes {stable_mosaic.version = 11 : i64} {
  func.func @kernel(%arg0: memref<16x32xf32, #tpu.memory_space<vmem>>, %arg1: memref<32x128xf32, #tpu.memory_space<vmem>>, %arg2: memref<32x128xf32, #tpu.memory_space<vmem>>, %arg3: memref<1x128xf32, #tpu.memory_space<vmem>>, %arg4: memref<32x128xf32, #tpu.memory_space<vmem>>, %arg5: memref<32x128xf32, #tpu.memory_space<vmem>>, %arg6: memref<1x128xf32, #tpu.memory_space<vmem>>, %arg7: memref<2x2x32xf32, #tpu.memory_space<vmem>>, %arg8: memref<2x2x32xf32, #tpu.memory_space<vmem>>, %arg9: memref<16x32xf32, #tpu.memory_space<vmem>>) attributes {dimension_semantics = [], scalar_prefetch = 0 : i64, scratch_operands = 1 : i64, tpu.core_type = #tpu.core_type<tc>} {
    %c0 = arith.constant 0 : index
    %c0_0 = arith.constant 0 : index
    %0 = vector.load %arg0[%c0, %c0_0] : memref<16x32xf32, #tpu.memory_space<vmem>>, vector<16x32xf32>
    %c0_1 = arith.constant 0 : index
    %c0_2 = arith.constant 0 : index
    %1 = vector.load %arg1[%c0_1, %c0_2] : memref<32x128xf32, #tpu.memory_space<vmem>>, vector<32x128xf32>
    %c0_3 = arith.constant 0 : index
    %c0_4 = arith.constant 0 : index
    %2 = vector.load %arg2[%c0_3, %c0_4] : memref<32x128xf32, #tpu.memory_space<vmem>>, vector<32x128xf32>
    %c0_5 = arith.constant 0 : index
    %c0_6 = arith.constant 0 : index
    %3 = vector.load %arg3[%c0_5, %c0_6] : memref<1x128xf32, #tpu.memory_space<vmem>>, vector<1x128xf32>
    %cst = arith.constant dense<0.000000e+00> : vector<16x128xf32>
    %4 = tpu.matmul %0, %1, %cst {dimension_numbers = #tpu.dot_dimension_numbers<[1], [0], [0], [1], [0, 0, 1, 1], [], []>} : vector<16x32xf32>, vector<32x128xf32>, vector<16x128xf32> -> vector<16x128xf32>
    %5 = vector.broadcast %3 : vector<1x128xf32> to vector<16x128xf32>
    %6 = arith.addf %4, %5 : vector<16x128xf32>
    %cst_7 = arith.constant 0.000000e+00 : f32
    %7 = vector.broadcast %cst_7 : f32 to vector<2x32xf32>
    %cst_8 = arith.constant 0.000000e+00 : f32
    %8 = vector.broadcast %cst_8 : f32 to vector<2x32xf32>
    %9 = vector.extract_strided_slice %6 {offsets = [0, 0], sizes = [2, 128], strides = [1, 1]} : vector<16x128xf32> to vector<2x128xf32>
    %cst_9 = arith.constant dense<0.000000e+00> : vector<2x128xf32>
    %10 = tpu.matmul %7, %2, %cst_9 {dimension_numbers = #tpu.dot_dimension_numbers<[1], [0], [0], [1], [0, 0, 1, 1], [], []>} : vector<2x32xf32>, vector<32x128xf32>, vector<2x128xf32> -> vector<2x128xf32>
    %11 = arith.addf %9, %10 : vector<2x128xf32>
    %12 = vector.extract_strided_slice %11 {offsets = [0, 0], sizes = [2, 32], strides = [1, 1]} : vector<2x128xf32> to vector<2x32xf32>
    %13 = arith.negf %12 : vector<2x32xf32>
    %14 = math.exp %13 : vector<2x32xf32>
    %cst_10 = arith.constant 1.000000e+00 : f32
    %15 = vector.broadcast %cst_10 : f32 to vector<2x32xf32>
    %16 = arith.addf %15, %14 : vector<2x32xf32>
    %17 = arith.divf %15, %16 : vector<2x32xf32>
    %18 = vector.extract_strided_slice %11 {offsets = [0, 32], sizes = [2, 32], strides = [1, 1]} : vector<2x128xf32> to vector<2x32xf32>
    %19 = arith.negf %18 : vector<2x32xf32>
    %20 = math.exp %19 : vector<2x32xf32>
    %cst_11 = arith.constant 1.000000e+00 : f32
    %21 = vector.broadcast %cst_11 : f32 to vector<2x32xf32>
    %22 = arith.addf %21, %20 : vector<2x32xf32>
    %23 = arith.divf %21, %22 : vector<2x32xf32>
    %24 = vector.extract_strided_slice %11 {offsets = [0, 64], sizes = [2, 32], strides = [1, 1]} : vector<2x128xf32> to vector<2x32xf32>
    %25 = math.tanh %24 : vector<2x32xf32>
    %26 = vector.extract_strided_slice %11 {offsets = [0, 96], sizes = [2, 32], strides = [1, 1]} : vector<2x128xf32> to vector<2x32xf32>
    %27 = arith.negf %26 : vector<2x32xf32>
    %28 = math.exp %27 : vector<2x32xf32>
    %cst_12 = arith.constant 1.000000e+00 : f32
    %29 = vector.broadcast %cst_12 : f32 to vector<2x32xf32>
    %30 = arith.addf %29, %28 : vector<2x32xf32>
    %31 = arith.divf %29, %30 : vector<2x32xf32>
    %32 = arith.mulf %23, %8 : vector<2x32xf32>
    %33 = arith.mulf %17, %25 : vector<2x32xf32>
    %34 = arith.addf %32, %33 : vector<2x32xf32>
    %35 = math.tanh %34 : vector<2x32xf32>
    %36 = arith.mulf %31, %35 : vector<2x32xf32>
    %c0_13 = arith.constant 0 : index
    %c0_14 = arith.constant 0 : index
    %37 = vector.load %arg9[%c0_13, %c0_14] : memref<16x32xf32, #tpu.memory_space<vmem>>, vector<2x32xf32>
    tpu.vector_store %arg9[%c0_13, %c0_14], %36 {strides = array<i32>} : memref<16x32xf32, #tpu.memory_space<vmem>>, vector<2x32xf32>,
    %38 = vector.extract_strided_slice %6 {offsets = [2, 0], sizes = [2, 128], strides = [1, 1]} : vector<16x128xf32> to vector<2x128xf32>
    %cst_15 = arith.constant dense<0.000000e+00> : vector<2x128xf32>
    %39 = tpu.matmul %36, %2, %cst_15 {dimension_numbers = #tpu.dot_dimension_numbers<[1], [0], [0], [1], [0, 0, 1, 1], [], []>} : vector<2x32xf32>, vector<32x128xf32>, vector<2x128xf32> -> vector<2x128xf32>
    %40 = arith.addf %38, %39 : vector<2x128xf32>
    %41 = vector.extract_strided_slice %40 {offsets = [0, 0], sizes = [2, 32], strides = [1, 1]} : vector<2x128xf32> to vector<2x32xf32>
    %42 = arith.negf %41 : vector<2x32xf32>
    %43 = math.exp %42 : vector<2x32xf32>
    %cst_16 = arith.constant 1.000000e+00 : f32
    %44 = vector.broadcast %cst_16 : f32 to vector<2x32xf32>
    %45 = arith.addf %44, %43 : vector<2x32xf32>
    %46 = arith.divf %44, %45 : vector<2x32xf32>
    %47 = vector.extract_strided_slice %40 {offsets = [0, 32], sizes = [2, 32], strides = [1, 1]} : vector<2x128xf32> to vector<2x32xf32>
    %48 = arith.negf %47 : vector<2x32xf32>
    %49 = math.exp %48 : vector<2x32xf32>
    %cst_17 = arith.constant 1.000000e+00 : f32
    %50 = vector.broadcast %cst_17 : f32 to vector<2x32xf32>
    %51 = arith.addf %50, %49 : vector<2x32xf32>
    %52 = arith.divf %50, %51 : vector<2x32xf32>
    %53 = vector.extract_strided_slice %40 {offsets = [0, 64], sizes = [2, 32], strides = [1, 1]} : vector<2x128xf32> to vector<2x32xf32>
    %54 = math.tanh %53 : vector<2x32xf32>
    %55 = vector.extract_strided_slice %40 {offsets = [0, 96], sizes = [2, 32], strides = [1, 1]} : vector<2x128xf32> to vector<2x32xf32>
    %56 = arith.negf %55 : vector<2x32xf32>
    %57 = math.exp %56 : vector<2x32xf32>
    %cst_18 = arith.constant 1.000000e+00 : f32
    %58 = vector.broadcast %cst_18 : f32 to vector<2x32xf32>
    %59 = arith.addf %58, %57 : vector<2x32xf32>
    %60 = arith.divf %58, %59 : vector<2x32xf32>
    %61 = arith.mulf %52, %34 : vector<2x32xf32>
    %62 = arith.mulf %46, %54 : vector<2x32xf32>
    %63 = arith.addf %61, %62 : vector<2x32xf32>
    %64 = math.tanh %63 : vector<2x32xf32>
    %65 = arith.mulf %60, %64 : vector<2x32xf32>
    %c2 = arith.constant 2 : index
    %c0_19 = arith.constant 0 : index
    %66 = vector.load %arg9[%c2, %c0_19] : memref<16x32xf32, #tpu.memory_space<vmem>>, vector<2x32xf32>
    tpu.vector_store %arg9[%c2, %c0_19], %65 {strides = array<i32>} : memref<16x32xf32, #tpu.memory_space<vmem>>, vector<2x32xf32>,
    %67 = vector.extract_strided_slice %6 {offsets = [4, 0], sizes = [2, 128], strides = [1, 1]} : vector<16x128xf32> to vector<2x128xf32>
    %cst_20 = arith.constant dense<0.000000e+00> : vector<2x128xf32>
    %68 = tpu.matmul %65, %2, %cst_20 {dimension_numbers = #tpu.dot_dimension_numbers<[1], [0], [0], [1], [0, 0, 1, 1], [], []>} : vector<2x32xf32>, vector<32x128xf32>, vector<2x128xf32> -> vector<2x128xf32>
    %69 = arith.addf %67, %68 : vector<2x128xf32>
    %70 = vector.extract_strided_slice %69 {offsets = [0, 0], sizes = [2, 32], strides = [1, 1]} : vector<2x128xf32> to vector<2x32xf32>
    %71 = arith.negf %70 : vector<2x32xf32>
    %72 = math.exp %71 : vector<2x32xf32>
    %cst_21 = arith.constant 1.000000e+00 : f32
    %73 = vector.broadcast %cst_21 : f32 to vector<2x32xf32>
    %74 = arith.addf %73, %72 : vector<2x32xf32>
    %75 = arith.divf %73, %74 : vector<2x32xf32>
    %76 = vector.extract_strided_slice %69 {offsets = [0, 32], sizes = [2, 32], strides = [1, 1]} : vector<2x128xf32> to vector<2x32xf32>
    %77 = arith.negf %76 : vector<2x32xf32>
    %78 = math.exp %77 : vector<2x32xf32>
    %cst_22 = arith.constant 1.000000e+00 : f32
    %79 = vector.broadcast %cst_22 : f32 to vector<2x32xf32>
    %80 = arith.addf %79, %78 : vector<2x32xf32>
    %81 = arith.divf %79, %80 : vector<2x32xf32>
    %82 = vector.extract_strided_slice %69 {offsets = [0, 64], sizes = [2, 32], strides = [1, 1]} : vector<2x128xf32> to vector<2x32xf32>
    %83 = math.tanh %82 : vector<2x32xf32>
    %84 = vector.extract_strided_slice %69 {offsets = [0, 96], sizes = [2, 32], strides = [1, 1]} : vector<2x128xf32> to vector<2x32xf32>
    %85 = arith.negf %84 : vector<2x32xf32>
    %86 = math.exp %85 : vector<2x32xf32>
    %cst_23 = arith.constant 1.000000e+00 : f32
    %87 = vector.broadcast %cst_23 : f32 to vector<2x32xf32>
    %88 = arith.addf %87, %86 : vector<2x32xf32>
    %89 = arith.divf %87, %88 : vector<2x32xf32>
    %90 = arith.mulf %81, %63 : vector<2x32xf32>
    %91 = arith.mulf %75, %83 : vector<2x32xf32>
    %92 = arith.addf %90, %91 : vector<2x32xf32>
    %93 = math.tanh %92 : vector<2x32xf32>
    %94 = arith.mulf %89, %93 : vector<2x32xf32>
    %c4 = arith.constant 4 : index
    %c0_24 = arith.constant 0 : index
    %95 = vector.load %arg9[%c4, %c0_24] : memref<16x32xf32, #tpu.memory_space<vmem>>, vector<2x32xf32>
    tpu.vector_store %arg9[%c4, %c0_24], %94 {strides = array<i32>} : memref<16x32xf32, #tpu.memory_space<vmem>>, vector<2x32xf32>,
    %96 = vector.extract_strided_slice %6 {offsets = [6, 0], sizes = [2, 128], strides = [1, 1]} : vector<16x128xf32> to vector<2x128xf32>
    %cst_25 = arith.constant dense<0.000000e+00> : vector<2x128xf32>
    %97 = tpu.matmul %94, %2, %cst_25 {dimension_numbers = #tpu.dot_dimension_numbers<[1], [0], [0], [1], [0, 0, 1, 1], [], []>} : vector<2x32xf32>, vector<32x128xf32>, vector<2x128xf32> -> vector<2x128xf32>
    %98 = arith.addf %96, %97 : vector<2x128xf32>
    %99 = vector.extract_strided_slice %98 {offsets = [0, 0], sizes = [2, 32], strides = [1, 1]} : vector<2x128xf32> to vector<2x32xf32>
    %100 = arith.negf %99 : vector<2x32xf32>
    %101 = math.exp %100 : vector<2x32xf32>
    %cst_26 = arith.constant 1.000000e+00 : f32
    %102 = vector.broadcast %cst_26 : f32 to vector<2x32xf32>
    %103 = arith.addf %102, %101 : vector<2x32xf32>
    %104 = arith.divf %102, %103 : vector<2x32xf32>
    %105 = vector.extract_strided_slice %98 {offsets = [0, 32], sizes = [2, 32], strides = [1, 1]} : vector<2x128xf32> to vector<2x32xf32>
    %106 = arith.negf %105 : vector<2x32xf32>
    %107 = math.exp %106 : vector<2x32xf32>
    %cst_27 = arith.constant 1.000000e+00 : f32
    %108 = vector.broadcast %cst_27 : f32 to vector<2x32xf32>
    %109 = arith.addf %108, %107 : vector<2x32xf32>
    %110 = arith.divf %108, %109 : vector<2x32xf32>
    %111 = vector.extract_strided_slice %98 {offsets = [0, 64], sizes = [2, 32], strides = [1, 1]} : vector<2x128xf32> to vector<2x32xf32>
    %112 = math.tanh %111 : vector<2x32xf32>
    %113 = vector.extract_strided_slice %98 {offsets = [0, 96], sizes = [2, 32], strides = [1, 1]} : vector<2x128xf32> to vector<2x32xf32>
    %114 = arith.negf %113 : vector<2x32xf32>
    %115 = math.exp %114 : vector<2x32xf32>
    %cst_28 = arith.constant 1.000000e+00 : f32
    %116 = vector.broadcast %cst_28 : f32 to vector<2x32xf32>
    %117 = arith.addf %116, %115 : vector<2x32xf32>
    %118 = arith.divf %116, %117 : vector<2x32xf32>
    %119 = arith.mulf %110, %92 : vector<2x32xf32>
    %120 = arith.mulf %104, %112 : vector<2x32xf32>
    %121 = arith.addf %119, %120 : vector<2x32xf32>
    %122 = math.tanh %121 : vector<2x32xf32>
    %123 = arith.mulf %118, %122 : vector<2x32xf32>
    %c6 = arith.constant 6 : index
    %c0_29 = arith.constant 0 : index
    %124 = vector.load %arg9[%c6, %c0_29] : memref<16x32xf32, #tpu.memory_space<vmem>>, vector<2x32xf32>
    tpu.vector_store %arg9[%c6, %c0_29], %123 {strides = array<i32>} : memref<16x32xf32, #tpu.memory_space<vmem>>, vector<2x32xf32>,
    %125 = vector.extract_strided_slice %6 {offsets = [8, 0], sizes = [2, 128], strides = [1, 1]} : vector<16x128xf32> to vector<2x128xf32>
    %cst_30 = arith.constant dense<0.000000e+00> : vector<2x128xf32>
    %126 = tpu.matmul %123, %2, %cst_30 {dimension_numbers = #tpu.dot_dimension_numbers<[1], [0], [0], [1], [0, 0, 1, 1], [], []>} : vector<2x32xf32>, vector<32x128xf32>, vector<2x128xf32> -> vector<2x128xf32>
    %127 = arith.addf %125, %126 : vector<2x128xf32>
    %128 = vector.extract_strided_slice %127 {offsets = [0, 0], sizes = [2, 32], strides = [1, 1]} : vector<2x128xf32> to vector<2x32xf32>
    %129 = arith.negf %128 : vector<2x32xf32>
    %130 = math.exp %129 : vector<2x32xf32>
    %cst_31 = arith.constant 1.000000e+00 : f32
    %131 = vector.broadcast %cst_31 : f32 to vector<2x32xf32>
    %132 = arith.addf %131, %130 : vector<2x32xf32>
    %133 = arith.divf %131, %132 : vector<2x32xf32>
    %134 = vector.extract_strided_slice %127 {offsets = [0, 32], sizes = [2, 32], strides = [1, 1]} : vector<2x128xf32> to vector<2x32xf32>
    %135 = arith.negf %134 : vector<2x32xf32>
    %136 = math.exp %135 : vector<2x32xf32>
    %cst_32 = arith.constant 1.000000e+00 : f32
    %137 = vector.broadcast %cst_32 : f32 to vector<2x32xf32>
    %138 = arith.addf %137, %136 : vector<2x32xf32>
    %139 = arith.divf %137, %138 : vector<2x32xf32>
    %140 = vector.extract_strided_slice %127 {offsets = [0, 64], sizes = [2, 32], strides = [1, 1]} : vector<2x128xf32> to vector<2x32xf32>
    %141 = math.tanh %140 : vector<2x32xf32>
    %142 = vector.extract_strided_slice %127 {offsets = [0, 96], sizes = [2, 32], strides = [1, 1]} : vector<2x128xf32> to vector<2x32xf32>
    %143 = arith.negf %142 : vector<2x32xf32>
    %144 = math.exp %143 : vector<2x32xf32>
    %cst_33 = arith.constant 1.000000e+00 : f32
    %145 = vector.broadcast %cst_33 : f32 to vector<2x32xf32>
    %146 = arith.addf %145, %144 : vector<2x32xf32>
    %147 = arith.divf %145, %146 : vector<2x32xf32>
    %148 = arith.mulf %139, %121 : vector<2x32xf32>
    %149 = arith.mulf %133, %141 : vector<2x32xf32>
    %150 = arith.addf %148, %149 : vector<2x32xf32>
    %151 = math.tanh %150 : vector<2x32xf32>
    %152 = arith.mulf %147, %151 : vector<2x32xf32>
    %c8 = arith.constant 8 : index
    %c0_34 = arith.constant 0 : index
    %153 = vector.load %arg9[%c8, %c0_34] : memref<16x32xf32, #tpu.memory_space<vmem>>, vector<2x32xf32>
    tpu.vector_store %arg9[%c8, %c0_34], %152 {strides = array<i32>} : memref<16x32xf32, #tpu.memory_space<vmem>>, vector<2x32xf32>,
    %154 = vector.extract_strided_slice %6 {offsets = [10, 0], sizes = [2, 128], strides = [1, 1]} : vector<16x128xf32> to vector<2x128xf32>
    %cst_35 = arith.constant dense<0.000000e+00> : vector<2x128xf32>
    %155 = tpu.matmul %152, %2, %cst_35 {dimension_numbers = #tpu.dot_dimension_numbers<[1], [0], [0], [1], [0, 0, 1, 1], [], []>} : vector<2x32xf32>, vector<32x128xf32>, vector<2x128xf32> -> vector<2x128xf32>
    %156 = arith.addf %154, %155 : vector<2x128xf32>
    %157 = vector.extract_strided_slice %156 {offsets = [0, 0], sizes = [2, 32], strides = [1, 1]} : vector<2x128xf32> to vector<2x32xf32>
    %158 = arith.negf %157 : vector<2x32xf32>
    %159 = math.exp %158 : vector<2x32xf32>
    %cst_36 = arith.constant 1.000000e+00 : f32
    %160 = vector.broadcast %cst_36 : f32 to vector<2x32xf32>
    %161 = arith.addf %160, %159 : vector<2x32xf32>
    %162 = arith.divf %160, %161 : vector<2x32xf32>
    %163 = vector.extract_strided_slice %156 {offsets = [0, 32], sizes = [2, 32], strides = [1, 1]} : vector<2x128xf32> to vector<2x32xf32>
    %164 = arith.negf %163 : vector<2x32xf32>
    %165 = math.exp %164 : vector<2x32xf32>
    %cst_37 = arith.constant 1.000000e+00 : f32
    %166 = vector.broadcast %cst_37 : f32 to vector<2x32xf32>
    %167 = arith.addf %166, %165 : vector<2x32xf32>
    %168 = arith.divf %166, %167 : vector<2x32xf32>
    %169 = vector.extract_strided_slice %156 {offsets = [0, 64], sizes = [2, 32], strides = [1, 1]} : vector<2x128xf32> to vector<2x32xf32>
    %170 = math.tanh %169 : vector<2x32xf32>
    %171 = vector.extract_strided_slice %156 {offsets = [0, 96], sizes = [2, 32], strides = [1, 1]} : vector<2x128xf32> to vector<2x32xf32>
    %172 = arith.negf %171 : vector<2x32xf32>
    %173 = math.exp %172 : vector<2x32xf32>
    %cst_38 = arith.constant 1.000000e+00 : f32
    %174 = vector.broadcast %cst_38 : f32 to vector<2x32xf32>
    %175 = arith.addf %174, %173 : vector<2x32xf32>
    %176 = arith.divf %174, %175 : vector<2x32xf32>
    %177 = arith.mulf %168, %150 : vector<2x32xf32>
    %178 = arith.mulf %162, %170 : vector<2x32xf32>
    %179 = arith.addf %177, %178 : vector<2x32xf32>
    %180 = math.tanh %179 : vector<2x32xf32>
    %181 = arith.mulf %176, %180 : vector<2x32xf32>
    %c10 = arith.constant 10 : index
    %c0_39 = arith.constant 0 : index
    %182 = vector.load %arg9[%c10, %c0_39] : memref<16x32xf32, #tpu.memory_space<vmem>>, vector<2x32xf32>
    tpu.vector_store %arg9[%c10, %c0_39], %181 {strides = array<i32>} : memref<16x32xf32, #tpu.memory_space<vmem>>, vector<2x32xf32>,
    %183 = vector.extract_strided_slice %6 {offsets = [12, 0], sizes = [2, 128], strides = [1, 1]} : vector<16x128xf32> to vector<2x128xf32>
    %cst_40 = arith.constant dense<0.000000e+00> : vector<2x128xf32>
    %184 = tpu.matmul %181, %2, %cst_40 {dimension_numbers = #tpu.dot_dimension_numbers<[1], [0], [0], [1], [0, 0, 1, 1], [], []>} : vector<2x32xf32>, vector<32x128xf32>, vector<2x128xf32> -> vector<2x128xf32>
    %185 = arith.addf %183, %184 : vector<2x128xf32>
    %186 = vector.extract_strided_slice %185 {offsets = [0, 0], sizes = [2, 32], strides = [1, 1]} : vector<2x128xf32> to vector<2x32xf32>
    %187 = arith.negf %186 : vector<2x32xf32>
    %188 = math.exp %187 : vector<2x32xf32>
    %cst_41 = arith.constant 1.000000e+00 : f32
    %189 = vector.broadcast %cst_41 : f32 to vector<2x32xf32>
    %190 = arith.addf %189, %188 : vector<2x32xf32>
    %191 = arith.divf %189, %190 : vector<2x32xf32>
    %192 = vector.extract_strided_slice %185 {offsets = [0, 32], sizes = [2, 32], strides = [1, 1]} : vector<2x128xf32> to vector<2x32xf32>
    %193 = arith.negf %192 : vector<2x32xf32>
    %194 = math.exp %193 : vector<2x32xf32>
    %cst_42 = arith.constant 1.000000e+00 : f32
    %195 = vector.broadcast %cst_42 : f32 to vector<2x32xf32>
    %196 = arith.addf %195, %194 : vector<2x32xf32>
    %197 = arith.divf %195, %196 : vector<2x32xf32>
    %198 = vector.extract_strided_slice %185 {offsets = [0, 64], sizes = [2, 32], strides = [1, 1]} : vector<2x128xf32> to vector<2x32xf32>
    %199 = math.tanh %198 : vector<2x32xf32>
    %200 = vector.extract_strided_slice %185 {offsets = [0, 96], sizes = [2, 32], strides = [1, 1]} : vector<2x128xf32> to vector<2x32xf32>
    %201 = arith.negf %200 : vector<2x32xf32>
    %202 = math.exp %201 : vector<2x32xf32>
    %cst_43 = arith.constant 1.000000e+00 : f32
    %203 = vector.broadcast %cst_43 : f32 to vector<2x32xf32>
    %204 = arith.addf %203, %202 : vector<2x32xf32>
    %205 = arith.divf %203, %204 : vector<2x32xf32>
    %206 = arith.mulf %197, %179 : vector<2x32xf32>
    %207 = arith.mulf %191, %199 : vector<2x32xf32>
    %208 = arith.addf %206, %207 : vector<2x32xf32>
    %209 = math.tanh %208 : vector<2x32xf32>
    %210 = arith.mulf %205, %209 : vector<2x32xf32>
    %c12 = arith.constant 12 : index
    %c0_44 = arith.constant 0 : index
    %211 = vector.load %arg9[%c12, %c0_44] : memref<16x32xf32, #tpu.memory_space<vmem>>, vector<2x32xf32>
    tpu.vector_store %arg9[%c12, %c0_44], %210 {strides = array<i32>} : memref<16x32xf32, #tpu.memory_space<vmem>>, vector<2x32xf32>,
    %212 = vector.extract_strided_slice %6 {offsets = [14, 0], sizes = [2, 128], strides = [1, 1]} : vector<16x128xf32> to vector<2x128xf32>
    %cst_45 = arith.constant dense<0.000000e+00> : vector<2x128xf32>
    %213 = tpu.matmul %210, %2, %cst_45 {dimension_numbers = #tpu.dot_dimension_numbers<[1], [0], [0], [1], [0, 0, 1, 1], [], []>} : vector<2x32xf32>, vector<32x128xf32>, vector<2x128xf32> -> vector<2x128xf32>
    %214 = arith.addf %212, %213 : vector<2x128xf32>
    %215 = vector.extract_strided_slice %214 {offsets = [0, 0], sizes = [2, 32], strides = [1, 1]} : vector<2x128xf32> to vector<2x32xf32>
    %216 = arith.negf %215 : vector<2x32xf32>
    %217 = math.exp %216 : vector<2x32xf32>
    %cst_46 = arith.constant 1.000000e+00 : f32
    %218 = vector.broadcast %cst_46 : f32 to vector<2x32xf32>
    %219 = arith.addf %218, %217 : vector<2x32xf32>
    %220 = arith.divf %218, %219 : vector<2x32xf32>
    %221 = vector.extract_strided_slice %214 {offsets = [0, 32], sizes = [2, 32], strides = [1, 1]} : vector<2x128xf32> to vector<2x32xf32>
    %222 = arith.negf %221 : vector<2x32xf32>
    %223 = math.exp %222 : vector<2x32xf32>
    %cst_47 = arith.constant 1.000000e+00 : f32
    %224 = vector.broadcast %cst_47 : f32 to vector<2x32xf32>
    %225 = arith.addf %224, %223 : vector<2x32xf32>
    %226 = arith.divf %224, %225 : vector<2x32xf32>
    %227 = vector.extract_strided_slice %214 {offsets = [0, 64], sizes = [2, 32], strides = [1, 1]} : vector<2x128xf32> to vector<2x32xf32>
    %228 = math.tanh %227 : vector<2x32xf32>
    %229 = vector.extract_strided_slice %214 {offsets = [0, 96], sizes = [2, 32], strides = [1, 1]} : vector<2x128xf32> to vector<2x32xf32>
    %230 = arith.negf %229 : vector<2x32xf32>
    %231 = math.exp %230 : vector<2x32xf32>
    %cst_48 = arith.constant 1.000000e+00 : f32
    %232 = vector.broadcast %cst_48 : f32 to vector<2x32xf32>
    %233 = arith.addf %232, %231 : vector<2x32xf32>
    %234 = arith.divf %232, %233 : vector<2x32xf32>
    %235 = arith.mulf %226, %208 : vector<2x32xf32>
    %236 = arith.mulf %220, %228 : vector<2x32xf32>
    %237 = arith.addf %235, %236 : vector<2x32xf32>
    %238 = math.tanh %237 : vector<2x32xf32>
    %239 = arith.mulf %234, %238 : vector<2x32xf32>
    %c14 = arith.constant 14 : index
    %c0_49 = arith.constant 0 : index
    %240 = vector.load %arg9[%c14, %c0_49] : memref<16x32xf32, #tpu.memory_space<vmem>>, vector<2x32xf32>
    tpu.vector_store %arg9[%c14, %c0_49], %239 {strides = array<i32>} : memref<16x32xf32, #tpu.memory_space<vmem>>, vector<2x32xf32>,
    %c0_50 = arith.constant 0 : index
    %c0_51 = arith.constant 0 : index
    %c0_52 = arith.constant 0 : index
    %241 = vector.load %arg7[%c0_50, %c0_51, %c0_52] : memref<2x2x32xf32, #tpu.memory_space<vmem>>, vector<1x2x32xf32>
    %242 = vector.shape_cast %241 : vector<1x2x32xf32> to vector<2x32xf32>
    %243 = vector.shape_cast %239 : vector<2x32xf32> to vector<1x2x32xf32>
    tpu.vector_store %arg7[%c0_50, %c0_51, %c0_52], %243 {strides = array<i32>} : memref<2x2x32xf32, #tpu.memory_space<vmem>>, vector<1x2x32xf32>,
    %c0_53 = arith.constant 0 : index
    %c0_54 = arith.constant 0 : index
    %c0_55 = arith.constant 0 : index
    %244 = vector.load %arg8[%c0_53, %c0_54, %c0_55] : memref<2x2x32xf32, #tpu.memory_space<vmem>>, vector<1x2x32xf32>
    %245 = vector.shape_cast %244 : vector<1x2x32xf32> to vector<2x32xf32>
    %246 = vector.shape_cast %237 : vector<2x32xf32> to vector<1x2x32xf32>
    tpu.vector_store %arg8[%c0_53, %c0_54, %c0_55], %246 {strides = array<i32>} : memref<2x2x32xf32, #tpu.memory_space<vmem>>, vector<1x2x32xf32>,
    %c0_56 = arith.constant 0 : index
    %c0_57 = arith.constant 0 : index
    %247 = vector.load %arg9[%c0_56, %c0_57] : memref<16x32xf32, #tpu.memory_space<vmem>>, vector<16x32xf32>
    %c0_58 = arith.constant 0 : index
    %c0_59 = arith.constant 0 : index
    %248 = vector.load %arg4[%c0_58, %c0_59] : memref<32x128xf32, #tpu.memory_space<vmem>>, vector<32x128xf32>
    %c0_60 = arith.constant 0 : index
    %c0_61 = arith.constant 0 : index
    %249 = vector.load %arg5[%c0_60, %c0_61] : memref<32x128xf32, #tpu.memory_space<vmem>>, vector<32x128xf32>
    %c0_62 = arith.constant 0 : index
    %c0_63 = arith.constant 0 : index
    %250 = vector.load %arg6[%c0_62, %c0_63] : memref<1x128xf32, #tpu.memory_space<vmem>>, vector<1x128xf32>
    %cst_64 = arith.constant dense<0.000000e+00> : vector<16x128xf32>
    %251 = tpu.matmul %247, %248, %cst_64 {dimension_numbers = #tpu.dot_dimension_numbers<[1], [0], [0], [1], [0, 0, 1, 1], [], []>} : vector<16x32xf32>, vector<32x128xf32>, vector<16x128xf32> -> vector<16x128xf32>
    %252 = vector.broadcast %250 : vector<1x128xf32> to vector<16x128xf32>
    %253 = arith.addf %251, %252 : vector<16x128xf32>
    %cst_65 = arith.constant 0.000000e+00 : f32
    %254 = vector.broadcast %cst_65 : f32 to vector<2x32xf32>
    %cst_66 = arith.constant 0.000000e+00 : f32
    %255 = vector.broadcast %cst_66 : f32 to vector<2x32xf32>
    %256 = vector.extract_strided_slice %253 {offsets = [0, 0], sizes = [2, 128], strides = [1, 1]} : vector<16x128xf32> to vector<2x128xf32>
    %cst_67 = arith.constant dense<0.000000e+00> : vector<2x128xf32>
    %257 = tpu.matmul %254, %249, %cst_67 {dimension_numbers = #tpu.dot_dimension_numbers<[1], [0], [0], [1], [0, 0, 1, 1], [], []>} : vector<2x32xf32>, vector<32x128xf32>, vector<2x128xf32> -> vector<2x128xf32>
    %258 = arith.addf %256, %257 : vector<2x128xf32>
    %259 = vector.extract_strided_slice %258 {offsets = [0, 0], sizes = [2, 32], strides = [1, 1]} : vector<2x128xf32> to vector<2x32xf32>
    %260 = arith.negf %259 : vector<2x32xf32>
    %261 = math.exp %260 : vector<2x32xf32>
    %cst_68 = arith.constant 1.000000e+00 : f32
    %262 = vector.broadcast %cst_68 : f32 to vector<2x32xf32>
    %263 = arith.addf %262, %261 : vector<2x32xf32>
    %264 = arith.divf %262, %263 : vector<2x32xf32>
    %265 = vector.extract_strided_slice %258 {offsets = [0, 32], sizes = [2, 32], strides = [1, 1]} : vector<2x128xf32> to vector<2x32xf32>
    %266 = arith.negf %265 : vector<2x32xf32>
    %267 = math.exp %266 : vector<2x32xf32>
    %cst_69 = arith.constant 1.000000e+00 : f32
    %268 = vector.broadcast %cst_69 : f32 to vector<2x32xf32>
    %269 = arith.addf %268, %267 : vector<2x32xf32>
    %270 = arith.divf %268, %269 : vector<2x32xf32>
    %271 = vector.extract_strided_slice %258 {offsets = [0, 64], sizes = [2, 32], strides = [1, 1]} : vector<2x128xf32> to vector<2x32xf32>
    %272 = math.tanh %271 : vector<2x32xf32>
    %273 = vector.extract_strided_slice %258 {offsets = [0, 96], sizes = [2, 32], strides = [1, 1]} : vector<2x128xf32> to vector<2x32xf32>
    %274 = arith.negf %273 : vector<2x32xf32>
    %275 = math.exp %274 : vector<2x32xf32>
    %cst_70 = arith.constant 1.000000e+00 : f32
    %276 = vector.broadcast %cst_70 : f32 to vector<2x32xf32>
    %277 = arith.addf %276, %275 : vector<2x32xf32>
    %278 = arith.divf %276, %277 : vector<2x32xf32>
    %279 = arith.mulf %270, %255 : vector<2x32xf32>
    %280 = arith.mulf %264, %272 : vector<2x32xf32>
    %281 = arith.addf %279, %280 : vector<2x32xf32>
    %282 = math.tanh %281 : vector<2x32xf32>
    %283 = arith.mulf %278, %282 : vector<2x32xf32>
    %284 = vector.extract_strided_slice %253 {offsets = [2, 0], sizes = [2, 128], strides = [1, 1]} : vector<16x128xf32> to vector<2x128xf32>
    %cst_71 = arith.constant dense<0.000000e+00> : vector<2x128xf32>
    %285 = tpu.matmul %283, %249, %cst_71 {dimension_numbers = #tpu.dot_dimension_numbers<[1], [0], [0], [1], [0, 0, 1, 1], [], []>} : vector<2x32xf32>, vector<32x128xf32>, vector<2x128xf32> -> vector<2x128xf32>
    %286 = arith.addf %284, %285 : vector<2x128xf32>
    %287 = vector.extract_strided_slice %286 {offsets = [0, 0], sizes = [2, 32], strides = [1, 1]} : vector<2x128xf32> to vector<2x32xf32>
    %288 = arith.negf %287 : vector<2x32xf32>
    %289 = math.exp %288 : vector<2x32xf32>
    %cst_72 = arith.constant 1.000000e+00 : f32
    %290 = vector.broadcast %cst_72 : f32 to vector<2x32xf32>
    %291 = arith.addf %290, %289 : vector<2x32xf32>
    %292 = arith.divf %290, %291 : vector<2x32xf32>
    %293 = vector.extract_strided_slice %286 {offsets = [0, 32], sizes = [2, 32], strides = [1, 1]} : vector<2x128xf32> to vector<2x32xf32>
    %294 = arith.negf %293 : vector<2x32xf32>
    %295 = math.exp %294 : vector<2x32xf32>
    %cst_73 = arith.constant 1.000000e+00 : f32
    %296 = vector.broadcast %cst_73 : f32 to vector<2x32xf32>
    %297 = arith.addf %296, %295 : vector<2x32xf32>
    %298 = arith.divf %296, %297 : vector<2x32xf32>
    %299 = vector.extract_strided_slice %286 {offsets = [0, 64], sizes = [2, 32], strides = [1, 1]} : vector<2x128xf32> to vector<2x32xf32>
    %300 = math.tanh %299 : vector<2x32xf32>
    %301 = vector.extract_strided_slice %286 {offsets = [0, 96], sizes = [2, 32], strides = [1, 1]} : vector<2x128xf32> to vector<2x32xf32>
    %302 = arith.negf %301 : vector<2x32xf32>
    %303 = math.exp %302 : vector<2x32xf32>
    %cst_74 = arith.constant 1.000000e+00 : f32
    %304 = vector.broadcast %cst_74 : f32 to vector<2x32xf32>
    %305 = arith.addf %304, %303 : vector<2x32xf32>
    %306 = arith.divf %304, %305 : vector<2x32xf32>
    %307 = arith.mulf %298, %281 : vector<2x32xf32>
    %308 = arith.mulf %292, %300 : vector<2x32xf32>
    %309 = arith.addf %307, %308 : vector<2x32xf32>
    %310 = math.tanh %309 : vector<2x32xf32>
    %311 = arith.mulf %306, %310 : vector<2x32xf32>
    %312 = vector.extract_strided_slice %253 {offsets = [4, 0], sizes = [2, 128], strides = [1, 1]} : vector<16x128xf32> to vector<2x128xf32>
    %cst_75 = arith.constant dense<0.000000e+00> : vector<2x128xf32>
    %313 = tpu.matmul %311, %249, %cst_75 {dimension_numbers = #tpu.dot_dimension_numbers<[1], [0], [0], [1], [0, 0, 1, 1], [], []>} : vector<2x32xf32>, vector<32x128xf32>, vector<2x128xf32> -> vector<2x128xf32>
    %314 = arith.addf %312, %313 : vector<2x128xf32>
    %315 = vector.extract_strided_slice %314 {offsets = [0, 0], sizes = [2, 32], strides = [1, 1]} : vector<2x128xf32> to vector<2x32xf32>
    %316 = arith.negf %315 : vector<2x32xf32>
    %317 = math.exp %316 : vector<2x32xf32>
    %cst_76 = arith.constant 1.000000e+00 : f32
    %318 = vector.broadcast %cst_76 : f32 to vector<2x32xf32>
    %319 = arith.addf %318, %317 : vector<2x32xf32>
    %320 = arith.divf %318, %319 : vector<2x32xf32>
    %321 = vector.extract_strided_slice %314 {offsets = [0, 32], sizes = [2, 32], strides = [1, 1]} : vector<2x128xf32> to vector<2x32xf32>
    %322 = arith.negf %321 : vector<2x32xf32>
    %323 = math.exp %322 : vector<2x32xf32>
    %cst_77 = arith.constant 1.000000e+00 : f32
    %324 = vector.broadcast %cst_77 : f32 to vector<2x32xf32>
    %325 = arith.addf %324, %323 : vector<2x32xf32>
    %326 = arith.divf %324, %325 : vector<2x32xf32>
    %327 = vector.extract_strided_slice %314 {offsets = [0, 64], sizes = [2, 32], strides = [1, 1]} : vector<2x128xf32> to vector<2x32xf32>
    %328 = math.tanh %327 : vector<2x32xf32>
    %329 = vector.extract_strided_slice %314 {offsets = [0, 96], sizes = [2, 32], strides = [1, 1]} : vector<2x128xf32> to vector<2x32xf32>
    %330 = arith.negf %329 : vector<2x32xf32>
    %331 = math.exp %330 : vector<2x32xf32>
    %cst_78 = arith.constant 1.000000e+00 : f32
    %332 = vector.broadcast %cst_78 : f32 to vector<2x32xf32>
    %333 = arith.addf %332, %331 : vector<2x32xf32>
    %334 = arith.divf %332, %333 : vector<2x32xf32>
    %335 = arith.mulf %326, %309 : vector<2x32xf32>
    %336 = arith.mulf %320, %328 : vector<2x32xf32>
    %337 = arith.addf %335, %336 : vector<2x32xf32>
    %338 = math.tanh %337 : vector<2x32xf32>
    %339 = arith.mulf %334, %338 : vector<2x32xf32>
    %340 = vector.extract_strided_slice %253 {offsets = [6, 0], sizes = [2, 128], strides = [1, 1]} : vector<16x128xf32> to vector<2x128xf32>
    %cst_79 = arith.constant dense<0.000000e+00> : vector<2x128xf32>
    %341 = tpu.matmul %339, %249, %cst_79 {dimension_numbers = #tpu.dot_dimension_numbers<[1], [0], [0], [1], [0, 0, 1, 1], [], []>} : vector<2x32xf32>, vector<32x128xf32>, vector<2x128xf32> -> vector<2x128xf32>
    %342 = arith.addf %340, %341 : vector<2x128xf32>
    %343 = vector.extract_strided_slice %342 {offsets = [0, 0], sizes = [2, 32], strides = [1, 1]} : vector<2x128xf32> to vector<2x32xf32>
    %344 = arith.negf %343 : vector<2x32xf32>
    %345 = math.exp %344 : vector<2x32xf32>
    %cst_80 = arith.constant 1.000000e+00 : f32
    %346 = vector.broadcast %cst_80 : f32 to vector<2x32xf32>
    %347 = arith.addf %346, %345 : vector<2x32xf32>
    %348 = arith.divf %346, %347 : vector<2x32xf32>
    %349 = vector.extract_strided_slice %342 {offsets = [0, 32], sizes = [2, 32], strides = [1, 1]} : vector<2x128xf32> to vector<2x32xf32>
    %350 = arith.negf %349 : vector<2x32xf32>
    %351 = math.exp %350 : vector<2x32xf32>
    %cst_81 = arith.constant 1.000000e+00 : f32
    %352 = vector.broadcast %cst_81 : f32 to vector<2x32xf32>
    %353 = arith.addf %352, %351 : vector<2x32xf32>
    %354 = arith.divf %352, %353 : vector<2x32xf32>
    %355 = vector.extract_strided_slice %342 {offsets = [0, 64], sizes = [2, 32], strides = [1, 1]} : vector<2x128xf32> to vector<2x32xf32>
    %356 = math.tanh %355 : vector<2x32xf32>
    %357 = vector.extract_strided_slice %342 {offsets = [0, 96], sizes = [2, 32], strides = [1, 1]} : vector<2x128xf32> to vector<2x32xf32>
    %358 = arith.negf %357 : vector<2x32xf32>
    %359 = math.exp %358 : vector<2x32xf32>
    %cst_82 = arith.constant 1.000000e+00 : f32
    %360 = vector.broadcast %cst_82 : f32 to vector<2x32xf32>
    %361 = arith.addf %360, %359 : vector<2x32xf32>
    %362 = arith.divf %360, %361 : vector<2x32xf32>
    %363 = arith.mulf %354, %337 : vector<2x32xf32>
    %364 = arith.mulf %348, %356 : vector<2x32xf32>
    %365 = arith.addf %363, %364 : vector<2x32xf32>
    %366 = math.tanh %365 : vector<2x32xf32>
    %367 = arith.mulf %362, %366 : vector<2x32xf32>
    %368 = vector.extract_strided_slice %253 {offsets = [8, 0], sizes = [2, 128], strides = [1, 1]} : vector<16x128xf32> to vector<2x128xf32>
    %cst_83 = arith.constant dense<0.000000e+00> : vector<2x128xf32>
    %369 = tpu.matmul %367, %249, %cst_83 {dimension_numbers = #tpu.dot_dimension_numbers<[1], [0], [0], [1], [0, 0, 1, 1], [], []>} : vector<2x32xf32>, vector<32x128xf32>, vector<2x128xf32> -> vector<2x128xf32>
    %370 = arith.addf %368, %369 : vector<2x128xf32>
    %371 = vector.extract_strided_slice %370 {offsets = [0, 0], sizes = [2, 32], strides = [1, 1]} : vector<2x128xf32> to vector<2x32xf32>
    %372 = arith.negf %371 : vector<2x32xf32>
    %373 = math.exp %372 : vector<2x32xf32>
    %cst_84 = arith.constant 1.000000e+00 : f32
    %374 = vector.broadcast %cst_84 : f32 to vector<2x32xf32>
    %375 = arith.addf %374, %373 : vector<2x32xf32>
    %376 = arith.divf %374, %375 : vector<2x32xf32>
    %377 = vector.extract_strided_slice %370 {offsets = [0, 32], sizes = [2, 32], strides = [1, 1]} : vector<2x128xf32> to vector<2x32xf32>
    %378 = arith.negf %377 : vector<2x32xf32>
    %379 = math.exp %378 : vector<2x32xf32>
    %cst_85 = arith.constant 1.000000e+00 : f32
    %380 = vector.broadcast %cst_85 : f32 to vector<2x32xf32>
    %381 = arith.addf %380, %379 : vector<2x32xf32>
    %382 = arith.divf %380, %381 : vector<2x32xf32>
    %383 = vector.extract_strided_slice %370 {offsets = [0, 64], sizes = [2, 32], strides = [1, 1]} : vector<2x128xf32> to vector<2x32xf32>
    %384 = math.tanh %383 : vector<2x32xf32>
    %385 = vector.extract_strided_slice %370 {offsets = [0, 96], sizes = [2, 32], strides = [1, 1]} : vector<2x128xf32> to vector<2x32xf32>
    %386 = arith.negf %385 : vector<2x32xf32>
    %387 = math.exp %386 : vector<2x32xf32>
    %cst_86 = arith.constant 1.000000e+00 : f32
    %388 = vector.broadcast %cst_86 : f32 to vector<2x32xf32>
    %389 = arith.addf %388, %387 : vector<2x32xf32>
    %390 = arith.divf %388, %389 : vector<2x32xf32>
    %391 = arith.mulf %382, %365 : vector<2x32xf32>
    %392 = arith.mulf %376, %384 : vector<2x32xf32>
    %393 = arith.addf %391, %392 : vector<2x32xf32>
    %394 = math.tanh %393 : vector<2x32xf32>
    %395 = arith.mulf %390, %394 : vector<2x32xf32>
    %396 = vector.extract_strided_slice %253 {offsets = [10, 0], sizes = [2, 128], strides = [1, 1]} : vector<16x128xf32> to vector<2x128xf32>
    %cst_87 = arith.constant dense<0.000000e+00> : vector<2x128xf32>
    %397 = tpu.matmul %395, %249, %cst_87 {dimension_numbers = #tpu.dot_dimension_numbers<[1], [0], [0], [1], [0, 0, 1, 1], [], []>} : vector<2x32xf32>, vector<32x128xf32>, vector<2x128xf32> -> vector<2x128xf32>
    %398 = arith.addf %396, %397 : vector<2x128xf32>
    %399 = vector.extract_strided_slice %398 {offsets = [0, 0], sizes = [2, 32], strides = [1, 1]} : vector<2x128xf32> to vector<2x32xf32>
    %400 = arith.negf %399 : vector<2x32xf32>
    %401 = math.exp %400 : vector<2x32xf32>
    %cst_88 = arith.constant 1.000000e+00 : f32
    %402 = vector.broadcast %cst_88 : f32 to vector<2x32xf32>
    %403 = arith.addf %402, %401 : vector<2x32xf32>
    %404 = arith.divf %402, %403 : vector<2x32xf32>
    %405 = vector.extract_strided_slice %398 {offsets = [0, 32], sizes = [2, 32], strides = [1, 1]} : vector<2x128xf32> to vector<2x32xf32>
    %406 = arith.negf %405 : vector<2x32xf32>
    %407 = math.exp %406 : vector<2x32xf32>
    %cst_89 = arith.constant 1.000000e+00 : f32
    %408 = vector.broadcast %cst_89 : f32 to vector<2x32xf32>
    %409 = arith.addf %408, %407 : vector<2x32xf32>
    %410 = arith.divf %408, %409 : vector<2x32xf32>
    %411 = vector.extract_strided_slice %398 {offsets = [0, 64], sizes = [2, 32], strides = [1, 1]} : vector<2x128xf32> to vector<2x32xf32>
    %412 = math.tanh %411 : vector<2x32xf32>
    %413 = vector.extract_strided_slice %398 {offsets = [0, 96], sizes = [2, 32], strides = [1, 1]} : vector<2x128xf32> to vector<2x32xf32>
    %414 = arith.negf %413 : vector<2x32xf32>
    %415 = math.exp %414 : vector<2x32xf32>
    %cst_90 = arith.constant 1.000000e+00 : f32
    %416 = vector.broadcast %cst_90 : f32 to vector<2x32xf32>
    %417 = arith.addf %416, %415 : vector<2x32xf32>
    %418 = arith.divf %416, %417 : vector<2x32xf32>
    %419 = arith.mulf %410, %393 : vector<2x32xf32>
    %420 = arith.mulf %404, %412 : vector<2x32xf32>
    %421 = arith.addf %419, %420 : vector<2x32xf32>
    %422 = math.tanh %421 : vector<2x32xf32>
    %423 = arith.mulf %418, %422 : vector<2x32xf32>
    %424 = vector.extract_strided_slice %253 {offsets = [12, 0], sizes = [2, 128], strides = [1, 1]} : vector<16x128xf32> to vector<2x128xf32>
    %cst_91 = arith.constant dense<0.000000e+00> : vector<2x128xf32>
    %425 = tpu.matmul %423, %249, %cst_91 {dimension_numbers = #tpu.dot_dimension_numbers<[1], [0], [0], [1], [0, 0, 1, 1], [], []>} : vector<2x32xf32>, vector<32x128xf32>, vector<2x128xf32> -> vector<2x128xf32>
    %426 = arith.addf %424, %425 : vector<2x128xf32>
    %427 = vector.extract_strided_slice %426 {offsets = [0, 0], sizes = [2, 32], strides = [1, 1]} : vector<2x128xf32> to vector<2x32xf32>
    %428 = arith.negf %427 : vector<2x32xf32>
    %429 = math.exp %428 : vector<2x32xf32>
    %cst_92 = arith.constant 1.000000e+00 : f32
    %430 = vector.broadcast %cst_92 : f32 to vector<2x32xf32>
    %431 = arith.addf %430, %429 : vector<2x32xf32>
    %432 = arith.divf %430, %431 : vector<2x32xf32>
    %433 = vector.extract_strided_slice %426 {offsets = [0, 32], sizes = [2, 32], strides = [1, 1]} : vector<2x128xf32> to vector<2x32xf32>
    %434 = arith.negf %433 : vector<2x32xf32>
    %435 = math.exp %434 : vector<2x32xf32>
    %cst_93 = arith.constant 1.000000e+00 : f32
    %436 = vector.broadcast %cst_93 : f32 to vector<2x32xf32>
    %437 = arith.addf %436, %435 : vector<2x32xf32>
    %438 = arith.divf %436, %437 : vector<2x32xf32>
    %439 = vector.extract_strided_slice %426 {offsets = [0, 64], sizes = [2, 32], strides = [1, 1]} : vector<2x128xf32> to vector<2x32xf32>
    %440 = math.tanh %439 : vector<2x32xf32>
    %441 = vector.extract_strided_slice %426 {offsets = [0, 96], sizes = [2, 32], strides = [1, 1]} : vector<2x128xf32> to vector<2x32xf32>
    %442 = arith.negf %441 : vector<2x32xf32>
    %443 = math.exp %442 : vector<2x32xf32>
    %cst_94 = arith.constant 1.000000e+00 : f32
    %444 = vector.broadcast %cst_94 : f32 to vector<2x32xf32>
    %445 = arith.addf %444, %443 : vector<2x32xf32>
    %446 = arith.divf %444, %445 : vector<2x32xf32>
    %447 = arith.mulf %438, %421 : vector<2x32xf32>
    %448 = arith.mulf %432, %440 : vector<2x32xf32>
    %449 = arith.addf %447, %448 : vector<2x32xf32>
    %450 = math.tanh %449 : vector<2x32xf32>
    %451 = arith.mulf %446, %450 : vector<2x32xf32>
    %452 = vector.extract_strided_slice %253 {offsets = [14, 0], sizes = [2, 128], strides = [1, 1]} : vector<16x128xf32> to vector<2x128xf32>
    %cst_95 = arith.constant dense<0.000000e+00> : vector<2x128xf32>
    %453 = tpu.matmul %451, %249, %cst_95 {dimension_numbers = #tpu.dot_dimension_numbers<[1], [0], [0], [1], [0, 0, 1, 1], [], []>} : vector<2x32xf32>, vector<32x128xf32>, vector<2x128xf32> -> vector<2x128xf32>
    %454 = arith.addf %452, %453 : vector<2x128xf32>
    %455 = vector.extract_strided_slice %454 {offsets = [0, 0], sizes = [2, 32], strides = [1, 1]} : vector<2x128xf32> to vector<2x32xf32>
    %456 = arith.negf %455 : vector<2x32xf32>
    %457 = math.exp %456 : vector<2x32xf32>
    %cst_96 = arith.constant 1.000000e+00 : f32
    %458 = vector.broadcast %cst_96 : f32 to vector<2x32xf32>
    %459 = arith.addf %458, %457 : vector<2x32xf32>
    %460 = arith.divf %458, %459 : vector<2x32xf32>
    %461 = vector.extract_strided_slice %454 {offsets = [0, 32], sizes = [2, 32], strides = [1, 1]} : vector<2x128xf32> to vector<2x32xf32>
    %462 = arith.negf %461 : vector<2x32xf32>
    %463 = math.exp %462 : vector<2x32xf32>
    %cst_97 = arith.constant 1.000000e+00 : f32
    %464 = vector.broadcast %cst_97 : f32 to vector<2x32xf32>
    %465 = arith.addf %464, %463 : vector<2x32xf32>
    %466 = arith.divf %464, %465 : vector<2x32xf32>
    %467 = vector.extract_strided_slice %454 {offsets = [0, 64], sizes = [2, 32], strides = [1, 1]} : vector<2x128xf32> to vector<2x32xf32>
    %468 = math.tanh %467 : vector<2x32xf32>
    %469 = vector.extract_strided_slice %454 {offsets = [0, 96], sizes = [2, 32], strides = [1, 1]} : vector<2x128xf32> to vector<2x32xf32>
    %470 = arith.negf %469 : vector<2x32xf32>
    %471 = math.exp %470 : vector<2x32xf32>
    %cst_98 = arith.constant 1.000000e+00 : f32
    %472 = vector.broadcast %cst_98 : f32 to vector<2x32xf32>
    %473 = arith.addf %472, %471 : vector<2x32xf32>
    %474 = arith.divf %472, %473 : vector<2x32xf32>
    %475 = arith.mulf %466, %449 : vector<2x32xf32>
    %476 = arith.mulf %460, %468 : vector<2x32xf32>
    %477 = arith.addf %475, %476 : vector<2x32xf32>
    %478 = math.tanh %477 : vector<2x32xf32>
    %479 = arith.mulf %474, %478 : vector<2x32xf32>
    %c1 = arith.constant 1 : index
    %c0_99 = arith.constant 0 : index
    %c0_100 = arith.constant 0 : index
    %480 = vector.load %arg7[%c1, %c0_99, %c0_100] : memref<2x2x32xf32, #tpu.memory_space<vmem>>, vector<1x2x32xf32>
    %481 = vector.shape_cast %480 : vector<1x2x32xf32> to vector<2x32xf32>
    %482 = vector.shape_cast %479 : vector<2x32xf32> to vector<1x2x32xf32>
    tpu.vector_store %arg7[%c1, %c0_99, %c0_100], %482 {strides = array<i32>} : memref<2x2x32xf32, #tpu.memory_space<vmem>>, vector<1x2x32xf32>,
    %c1_101 = arith.constant 1 : index
    %c0_102 = arith.constant 0 : index
    %c0_103 = arith.constant 0 : index
    %483 = vector.load %arg8[%c1_101, %c0_102, %c0_103] : memref<2x2x32xf32, #tpu.memory_space<vmem>>, vector<1x2x32xf32>
    %484 = vector.shape_cast %483 : vector<1x2x32xf32> to vector<2x32xf32>
    %485 = vector.shape_cast %477 : vector<2x32xf32> to vector<1x2x32xf32>
    tpu.vector_store %arg8[%c1_101, %c0_102, %c0_103], %485 {strides = array<i32>} : memref<2x2x32xf32, #tpu.memory_space<vmem>>, vector<1x2x32xf32>,
    return
  }
}

</mosaic_0001>

<bundles_post_ra>
// kernel: encoder_forward.1
= control target key start
LH: loop header
LB: loop body
LE: loop exit
PB: predicated region body
PF: predicated region fallthrough
CT: control target
= control target key end

     0   :  { %14 = vsyncpa [#allocation4], 0  ;;  %s1853_s0 = inlined_call_operand.vmem [shape: f32[16,32], index: 0, kind: input, shape index: {}]   ;;  %s1854_s1 = inlined_call_operand.vmem [shape: f32[32,128], index: 1, kind: input, shape index: {}]   ;;  %s1855_s2 = inlined_call_operand.vmem [shape: f32[32,128], index: 2, kind: input, shape index: {}]   ;;  %s1856_s3 = inlined_call_operand.vmem [shape: f32[1,128], index: 3, kind: input, shape index: {}]   ;;  %s1857_s4 = inlined_call_operand.vmem [shape: f32[32,128], index: 4, kind: input, shape index: {}]   ;;  %s1858_s5 = inlined_call_operand.vmem [shape: f32[32,128], index: 5, kind: input, shape index: {}]   ;;  %s1859_s6 = inlined_call_operand.vmem [shape: f32[1,128], index: 6, kind: input, shape index: {}]   ;;  %s1860_s7 = inlined_call_operand.hbm [shape: f32[2,2,32], index: 7, kind: output, shape index: {0}]   ;;  %s1861_s8 = inlined_call_operand.hbm [shape: f32[2,2,32], index: 8, kind: output, shape index: {1}]  }
   0x1   :  { %v35_v0 = vld [vmem:[%s1854_s1 + $0x18] sm:$0xff]  ;;  %v34_v1 = vld [vmem:[%s1854_s1 + $0x10] sm:$0xff]  ;;  %v33_v4 = vld [vmem:[%s1854_s1 + $0x8] sm:$0xff] }
   0x2   :  { %v39_v2 = vld [vmem:[%s1855_s2 + $0x18] sm:$0xff]  ;;  %63 = vmatpush.msra.mxu0 %v35_v0  ;;  %v38_v3 = vld [vmem:[%s1855_s2 + $0x10] sm:$0xff]  ;;  %v37_v5 = vld [vmem:[%s1855_s2 + $0x8] sm:$0xff] }
   0x3   :  { %89 = vmatpush.msra.mxu1 %v39_v2  ;;  %155 = vmatpush.msra.mxu2 %v39_v2  ;;  %v32_v6 = vld [vmem:[%s1854_s1] sm:$0xff] }
   0x4   :  { %230 = vmatpush.msra.mxu3 %v39_v2  ;;  %64 = vmatpush.msra.mxu0 %v34_v1  ;;  %v36_v7 = vld [vmem:[%s1855_s2] sm:$0xff] }
   0x5   :  { %90 = vmatpush.msra.mxu1 %v38_v3  ;;  %156 = vmatpush.msra.mxu2 %v38_v3 }
   0x6   :  { %231 = vmatpush.msra.mxu3 %v38_v3 }
   0x7   :  { %15 = vsyncpa [#allocation6], 0  ;;  %65 = vmatpush.msra.mxu0 %v33_v4  ;;  %91 = vmatpush.msra.mxu1 %v37_v5  ;;  %v30_v8 = vld [vmem:[%s1853_s0] sm:$0xff]  ;;  %vm44_vm0 = vcmask 261120   ;;  %v1516_v9 = vmov 0.0   ;;  %s1517_s23 = smov 64  }
   0x8   :  { %157 = vmatpush.msra.mxu2 %v37_v5  ;;  %232 = vmatpush.msra.mxu3 %v37_v5  ;;  %v1600_v10 = vld [vmem:[%s1856_s3] ss:$0 sm:$0xff]  ;;  %s1518_s3 = smov 32   ;;  %vm139_vm5 = vcmask 254976   ;;  %s1520_s19 = smov [#allocation5]  }
   0x9   :  { %66 = vmatpush.msra.mxu0 %v32_v6  ;;  %92 = vmatpush.msra.mxu1 %v36_v7  ;;  %s1274_s20 = sshll.u32 %s1520_s19, 4  ;;  %s1276_s1 = sshll.u32 %s1861_s8, 4  ;;  %s1275_s20 = int_to_ptr.vmem [resolvable:$true] %s1274_s20  ;;  %s1277_s1 = int_to_ptr.hbm [resolvable:$true] %s1276_s1 }
   0xa   :  { %1293 = vmatmul.msk.f32.vlgmr.msra.gmra.mxu0 %vm44_vm0, %v30_v8  ;;  %93 = vmatmul.f32.vlgmr.msra.gmra.mxu1 %v1516_v9  ;;  %s1521_s2 = smov 2   ;;  %s1263_s26 = sshll.u32 %s1860_s7, 4  ;;  %s1264_s26 = int_to_ptr.hbm [resolvable:$true] %s1263_s26 }
   0xb   :  { %158 = vmatpush.msra.mxu2 %v36_v7  ;;  %233 = vmatpush.msra.mxu3 %v36_v7 }
   0xc   :  { %305 = vmatpush.msrb.mxu1 %v39_v2  ;;  %522 = vmatpush.msrb.mxu0 %v39_v2 }
   0xd   :  { %380 = vmatpush.msrb.mxu2 %v39_v2  ;;  %448 = vmatpush.msrb.mxu3 %v39_v2 }
   0xe   :  { %306 = vmatpush.msrb.mxu1 %v38_v3  ;;  %523 = vmatpush.msrb.mxu0 %v38_v3 }
   0xf   :  { %381 = vmatpush.msrb.mxu2 %v38_v3  ;;  %449 = vmatpush.msrb.mxu3 %v38_v3 }
  0x10   :  { %307 = vmatpush.msrb.mxu1 %v37_v5  ;;  %524 = vmatpush.msrb.mxu0 %v37_v5 }
  0x11   :  { %382 = vmatpush.msrb.mxu2 %v37_v5  ;;  %450 = vmatpush.msrb.mxu3 %v37_v5 }
  0x12   :  { %308 = vmatpush.msrb.mxu1 %v36_v7  ;;  %525 = vmatpush.msrb.mxu0 %v36_v7 }
  0x13   :  { %383 = vmatpush.msrb.mxu2 %v36_v7  ;;  %451 = vmatpush.msrb.mxu3 %v36_v7 }
  0x14   :  { %596 = vmatpush.msra.mxu1 %v39_v2 }
  0x16   :  { %597 = vmatpush.msra.mxu1 %v38_v3 }
  0x18   :  { %598 = vmatpush.msra.mxu1 %v37_v5 }
  0x1a   :  { %599 = vmatpush.msra.mxu1 %v36_v7 }
  0x87   :  { %v68_v11 = vpop.f32.mrf.mxu0  ;;  %v94_v12 = vpop.f32.mrf.mxu1 }
  0x88   :  { %v1603_v13 = vadd.f32 %v1600_v10, %v68_v11 }
  0x8a   :  { %v97_v14 = vadd.f32 %v94_v12, %v1603_v13 }
  0x8c   :  { %1336 = vtanh.f32 %v97_v14  ;;  %v1295_v16 = vmul.f32 -1.442695, %v97_v14 }
  0x8e   :  { %1338 = vpow2.f32 %v1295_v16 }
  0x92   :  { %v1337_v15 = vpop.eup %1336 }
  0x93   :  { %120 = vrot.lane.b32.xlu0 %v1337_v15, %s1517_s23 }
  0x94   :  { %v1339_v17 = vpop.eup %1338 }
  0x95   :  { %v101_v18 = vadd.f32 1.0, %v1339_v17 }
  0x97   :  { %1340 = vrcp.f32 %v101_v18  ;;  %v113_v24 = vand.u32 2147483648, %v101_v18  ;;  %vm107_vm2 = vweird.f32 %v101_v18  ;;  %v111_v25 = vand.u32 2147483647, %v101_v18 }
  0x99   :  { %v114_v27 = vor.u32 1.1754944e-38, %v113_v24  ;;  %vm112_vm4 = vcmp.eq.f32.partialorder %v111_v25, 8.507059e+37 }
  0x9d   :  { %v1341_v19 = vpop.eup %1340 }
  0x9e   :  { %v103_v20 = vmul.f32 %v1341_v19, %v101_v18  ;;  %vm108_vm1 = vweird.f32 %v1341_v19 }
  0x9f   :  { %vm109_vm3 = vmor %vm107_vm2, %vm108_vm1 }
  0xa0   :  { %v104_v21 = vsub.f32 1.0, %v103_v20 }
  0xa2   :  { %v105_v22 = vmul.f32 %v1341_v19, %v104_v21 }
  0xa4   :  { %v106_v23 = vadd.f32 %v1341_v19, %v105_v22 }
  0xa6   :  { %v110_v26 = vsel %vm109_vm3, %v1341_v19, %v106_v23 }
  0xa7   :  { %v115_v29 = vsel %vm112_vm4, %v114_v27, %v110_v26 }
  0xa8   :  { %v118_v31 = vmul.f32 0.0, %v115_v29 }
 0x105   :  { %v121_v28 = vpop.permute.xlu0 %120 }
 0x106   :  { %v123_v30 = vmul.f32 %v121_v28, %v115_v29 }
 0x108   :  { %125 = vrot.lane.b32.xlu0 %v123_v30, %s1518_s3 }
 0x17a   :  { %v126_v32 = vpop.permute.xlu0 %125 }
 0x17b   :  { %v128_v33 = vadd.f32 %v126_v32, %v118_v31 }
 0x17d   :  { %1342 = vtanh.f32 %v128_v33  ;;  %v188_v57 = vrot.slane %v128_v33, 6 }
 0x183   :  { %v1343_v34 = vpop.eup %1342 }
 0x184   :  { %131 = vrot.lane.b32.xlu1 %v1343_v34, %s1517_s23 }
 0x1f6   :  { %v132_v35 = vpop.permute.xlu1 %131 }
 0x1f7   :  { %v134_v36 = vmul.f32 %v132_v35, %v115_v29 }
 0x1f9   :  { %136 = vrot.lane.b32.xlu1 %v134_v36, %s1518_s3 }
 0x26b   :  { %v137_v37 = vpop.permute.xlu1 %136 }
 0x26c   :  { %140 = vst.msk [vmem:[#allocation2] sm:$0x3] %vm139_vm5, %v137_v37  ;;  %1296 = vmatmul.msk.f32.vlgmr.msra.gmra.mxu2 %vm44_vm0, %v137_v37 }
 0x2ef   :  { %v160_v38 = vpop.f32.mrf.mxu2 }
 0x2f0   :  { %v164_v39 = vrot.slane %v160_v38, 6 }
 0x2f2   :  { %v166_v40 = vadd.f32 %v164_v39, %v1603_v13 }
 0x2f4   :  { %1344 = vtanh.f32 %v166_v40  ;;  %v1297_v42 = vmul.f32 -1.442695, %v166_v40 }
 0x2f6   :  { %1346 = vpow2.f32 %v1297_v42 }
 0x2fa   :  { %v1345_v41 = vpop.eup %1344 }
 0x2fb   :  { %192 = vrot.lane.b32.xlu2 %v1345_v41, %s1517_s23 }
 0x2fc   :  { %v1347_v43 = vpop.eup %1346 }
 0x2fd   :  { %v170_v44 = vadd.f32 1.0, %v1347_v43 }
 0x2ff   :  { %1348 = vrcp.f32 %v170_v44  ;;  %v182_v50 = vand.u32 2147483648, %v170_v44  ;;  %vm176_vm7 = vweird.f32 %v170_v44  ;;  %v180_v51 = vand.u32 2147483647, %v170_v44 }
 0x301   :  { %v183_v53 = vor.u32 1.1754944e-38, %v182_v50  ;;  %vm181_vm9 = vcmp.eq.f32.partialorder %v180_v51, 8.507059e+37 }
 0x305   :  { %v1349_v45 = vpop.eup %1348 }
 0x306   :  { %v172_v46 = vmul.f32 %v1349_v45, %v170_v44  ;;  %vm177_vm6 = vweird.f32 %v1349_v45 }
 0x307   :  { %vm178_vm8 = vmor %vm176_vm7, %vm177_vm6 }
 0x308   :  { %v173_v47 = vsub.f32 1.0, %v172_v46 }
 0x30a   :  { %v174_v48 = vmul.f32 %v1349_v45, %v173_v47 }
 0x30c   :  { %v175_v49 = vadd.f32 %v1349_v45, %v174_v48 }
 0x30e   :  { %v179_v52 = vsel %vm178_vm8, %v1349_v45, %v175_v49  ;;  %vm211_vm8 = vcmask 257026  }
 0x30f   :  { %v184_v55 = vsel %vm181_vm9, %v183_v53, %v179_v52  ;;  %vm286_vm9 = vcmask 259076  }
 0x310   :  { %v190_v58 = vmul.f32 %v188_v57, %v184_v55 }
 0x355   :  { %v193_v54 = vpop.permute.xlu2 %192 }
 0x356   :  { %v195_v56 = vmul.f32 %v193_v54, %v184_v55 }
 0x358   :  { %197 = vrot.lane.b32.xlu2 %v195_v56, %s1518_s3 }
 0x3b2   :  { %v198_v59 = vpop.permute.xlu2 %197 }
 0x3b3   :  { %v200_v60 = vadd.f32 %v198_v59, %v190_v58  ;;  %v31_v59 = vld [vmem:[%s1853_s0 + $0x8] sm:$0xff] }
 0x3b4   :  { %1294 = vmatmul.msk.f32.gmra.mxu0 %vm44_vm0, %v31_v59 }
 0x3b5   :  { %1350 = vtanh.f32 %v200_v60  ;;  %v263_v24 = vrot.slane %v200_v60, 6 }
 0x3bb   :  { %v1351_v61 = vpop.eup %1350 }
 0x3bc   :  { %203 = vrot.lane.b32.xlu0 %v1351_v61, %s1517_s23 }
 0x42e   :  { %v204_v62 = vpop.permute.xlu0 %203 }
 0x42f   :  { %v1616_v63 = vmul.f32 %v204_v62, %v184_v55 }
 0x431   :  { %v213_v0 = vrot.slane %v1616_v63, 2  ;;  %v71_v61 = vpop.f32.mrf.mxu0 }
 0x432   :  { %v1641_v62 = vadd.f32 %v1600_v10, %v71_v61 }
 0x433   :  { %214 = vrot.lane.b32.xlu1 %v213_v0, %s1518_s3 }
 0x4a5   :  { %v215_v1 = vpop.permute.xlu1 %214 }
 0x4a6   :  { %1298 = vmatmul.msk.f32.vlgmr.msra.gmra.mxu3 %vm44_vm0, %v215_v1 }
 0x529   :  { %v235_v2 = vpop.f32.mrf.mxu3 }
 0x52a   :  { %v239_v3 = vrot.slane %v235_v2, 4 }
 0x52c   :  { %v241_v4 = vadd.f32 %v239_v3, %v1603_v13 }
 0x52e   :  { %1352 = vtanh.f32 %v241_v4  ;;  %v1299_v6 = vmul.f32 -1.442695, %v241_v4 }
 0x530   :  { %1354 = vpow2.f32 %v1299_v6 }
 0x534   :  { %v1353_v5 = vpop.eup %1352 }
 0x535   :  { %267 = vrot.lane.b32.xlu2 %v1353_v5, %s1517_s23 }
 0x536   :  { %v1355_v7 = vpop.eup %1354 }
 0x537   :  { %v245_v8 = vadd.f32 1.0, %v1355_v7 }
 0x539   :  { %1356 = vrcp.f32 %v245_v8  ;;  %v257_v17 = vand.u32 2147483648, %v245_v8  ;;  %vm251_vm11 = vweird.f32 %v245_v8  ;;  %v255_v18 = vand.u32 2147483647, %v245_v8 }
 0x53b   :  { %v258_v20 = vor.u32 1.1754944e-38, %v257_v17  ;;  %vm256_vm13 = vcmp.eq.f32.partialorder %v255_v18, 8.507059e+37 }
 0x53f   :  { %v1357_v11 = vpop.eup %1356 }
 0x540   :  { %v247_v12 = vmul.f32 %v1357_v11, %v245_v8  ;;  %vm252_vm10 = vweird.f32 %v1357_v11 }
 0x541   :  { %vm253_vm12 = vmor %vm251_vm11, %vm252_vm10  ;;  %vm361_vm10 = vcmask 261126  }
 0x542   :  { %v248_v14 = vsub.f32 1.0, %v247_v12 }
 0x544   :  { %v249_v15 = vmul.f32 %v1357_v11, %v248_v14 }
 0x546   :  { %v250_v16 = vadd.f32 %v1357_v11, %v249_v15 }
 0x548   :  { %v254_v19 = vsel %vm253_vm12, %v1357_v11, %v250_v16 }
 0x549   :  { %v259_v22 = vsel %vm256_vm13, %v258_v20, %v254_v19 }
 0x54a   :  { %v265_v25 = vmul.f32 %v263_v24, %v259_v22 }
 0x58f   :  { %v268_v21 = vpop.permute.xlu2 %267 }
 0x590   :  { %v270_v23 = vmul.f32 %v268_v21, %v259_v22 }
 0x592   :  { %272 = vrot.lane.b32.xlu0 %v270_v23, %s1518_s3 }
 0x604   :  { %v273_v26 = vpop.permute.xlu0 %272 }
 0x605   :  { %v275_v27 = vadd.f32 %v273_v26, %v265_v25 }
 0x607   :  { %1358 = vtanh.f32 %v275_v27  ;;  %v338_v51 = vrot.slane %v275_v27, 6 }
 0x60d   :  { %v1359_v28 = vpop.eup %1358 }
 0x60e   :  { %278 = vrot.lane.b32.xlu1 %v1359_v28, %s1517_s23  ;;  %v664_v28 = vld [vmem:[%s1857_s4 + $0x18] sm:$0xff] }
 0x60f   :  { %691 = vmatpush.msra.mxu2 %v664_v28 }
 0x680   :  { %v279_v29 = vpop.permute.xlu1 %278 }
 0x681   :  { %v1625_v30 = vmul.f32 %v279_v29, %v259_v22  ;;  %v663_v29 = vld [vmem:[%s1857_s4 + $0x10] sm:$0xff] }
 0x682   :  { %692 = vmatpush.msra.mxu2 %v663_v29 }
 0x683   :  { %v288_v31 = vrot.slane %v1625_v30, 4 }
 0x685   :  { %289 = vrot.lane.b32.xlu2 %v288_v31, %s1518_s3  ;;  %v1673_v31 = vld [vmem:[%s1858_s5 + $0x10] sm:$0xff] }
 0x6df   :  { %v290_v32 = vpop.permute.xlu2 %289 }
 0x6e0   :  { %1300 = vmatmul.msk.f32.vlgmr.msrb.gmra.mxu1 %vm44_vm0, %v290_v32  ;;  %v662_v32 = vld [vmem:[%s1857_s4 + $0x8] sm:$0xff] }
 0x6e1   :  { %693 = vmatpush.msra.mxu2 %v662_v32 }
 0x75d   :  { %v310_v33 = vpop.f32.mrf.mxu1 }
 0x75e   :  { %v314_v34 = vrot.slane %v310_v33, 2  ;;  %v1681_v33 = vld [vmem:[%s1858_s5 + $0x8] sm:$0xff] }
 0x760   :  { %v316_v35 = vadd.f32 %v314_v34, %v1603_v13  ;;  %v661_v34 = vld [vmem:[%s1857_s4] sm:$0xff] }
 0x761   :  { %694 = vmatpush.msra.mxu2 %v661_v34 }
 0x762   :  { %1360 = vtanh.f32 %v316_v35  ;;  %v1301_v37 = vmul.f32 -1.442695, %v316_v35  ;;  %v1697_v35 = vld [vmem:[%s1858_s5] sm:$0xff] }
 0x764   :  { %1362 = vpow2.f32 %v1301_v37 }
 0x768   :  { %v1361_v36 = vpop.eup %1360 }
 0x769   :  { %342 = vrot.lane.b32.xlu0 %v1361_v36, %s1517_s23 }
 0x76a   :  { %v1363_v38 = vpop.eup %1362 }
 0x76b   :  { %v320_v39 = vadd.f32 1.0, %v1363_v38 }
 0x76d   :  { %1364 = vrcp.f32 %v320_v39  ;;  %v332_v45 = vand.u32 2147483648, %v320_v39  ;;  %vm326_vm15 = vweird.f32 %v320_v39  ;;  %v330_v46 = vand.u32 2147483647, %v320_v39 }
 0x76f   :  { %v333_v47 = vor.u32 1.1754944e-38, %v332_v45  ;;  %vm331_vm2 = vcmp.eq.f32.partialorder %v330_v46, 8.507059e+37 }
 0x773   :  { %v1365_v40 = vpop.eup %1364 }
 0x774   :  { %v322_v41 = vmul.f32 %v1365_v40, %v320_v39  ;;  %vm327_vm14 = vweird.f32 %v1365_v40 }
 0x775   :  { %vm328_vm1 = vmor %vm326_vm15, %vm327_vm14 }
 0x776   :  { %v323_v42 = vsub.f32 1.0, %v322_v41 }
 0x778   :  { %v324_v43 = vmul.f32 %v1365_v40, %v323_v42 }
 0x77a   :  { %v325_v44 = vadd.f32 %v1365_v40, %v324_v43 }
 0x77c   :  { %v329_v13 = vsel %vm328_vm1, %v1365_v40, %v325_v44 }
 0x77d   :  { %v334_v49 = vsel %vm331_vm2, %v333_v47, %v329_v13 }
 0x77e   :  { %v340_v52 = vmul.f32 %v338_v51, %v334_v49 }
 0x7db   :  { %v343_v48 = vpop.permute.xlu0 %342 }
 0x7dc   :  { %v345_v50 = vmul.f32 %v343_v48, %v334_v49 }
 0x7de   :  { %347 = vrot.lane.b32.xlu1 %v345_v50, %s1518_s3 }
 0x850   :  { %v348_v53 = vpop.permute.xlu1 %347 }
 0x851   :  { %v350_v54 = vadd.f32 %v348_v53, %v340_v52 }
 0x853   :  { %1366 = vtanh.f32 %v350_v54  ;;  %v410_v20 = vrot.slane %v350_v54, 6 }
 0x859   :  { %v1367_v55 = vpop.eup %1366 }
 0x85a   :  { %353 = vrot.lane.b32.xlu2 %v1367_v55, %s1517_s23 }
 0x8b4   :  { %v354_v56 = vpop.permute.xlu2 %353 }
 0x8b5   :  { %v356_v57 = vmul.f32 %v354_v56, %v334_v49 }
 0x8b7   :  { %v363_v58 = vrot.slane %v356_v57, 6 }
 0x8b9   :  { %364 = vrot.lane.b32.xlu0 %v363_v58, %s1518_s3 }
 0x92b   :  { %v365_v60 = vpop.permute.xlu0 %364 }
 0x92c   :  { %1302 = vmatmul.msk.f32.vlgmr.msrb.gmra.mxu2 %vm44_vm0, %v365_v60 }
 0x9af   :  { %v385_v0 = vpop.f32.mrf.mxu2 }
 0x9b0   :  { %v388_v1 = vadd.f32 %v385_v0, %v1641_v62 }
 0x9b2   :  { %1368 = vtanh.f32 %v388_v1  ;;  %v1303_v3 = vmul.f32 -1.442695, %v388_v1 }
 0x9b4   :  { %1370 = vpow2.f32 %v1303_v3 }
 0x9b8   :  { %v1369_v2 = vpop.eup %1368 }
 0x9b9   :  { %414 = vrot.lane.b32.xlu1 %v1369_v2, %s1517_s23 }
 0x9ba   :  { %v1371_v4 = vpop.eup %1370 }
 0x9bb   :  { %v392_v5 = vadd.f32 1.0, %v1371_v4 }
 0x9bd   :  { %1372 = vrcp.f32 %v392_v5  ;;  %v404_v10 = vand.u32 2147483648, %v392_v5  ;;  %vm398_vm4 = vweird.f32 %v392_v5  ;;  %v402_v14 = vand.u32 2147483647, %v392_v5 }
 0x9bf   :  { %v405_v16 = vor.u32 1.1754944e-38, %v404_v10  ;;  %vm403_vm7 = vcmp.eq.f32.partialorder %v402_v14, 8.507059e+37 }
 0x9c3   :  { %v1373_v6 = vpop.eup %1372 }
 0x9c4   :  { %v394_v7 = vmul.f32 %v1373_v6, %v392_v5  ;;  %vm399_vm3 = vweird.f32 %v1373_v6 }
 0x9c5   :  { %vm400_vm6 = vmor %vm398_vm4, %vm399_vm3 }
 0x9c6   :  { %v395_v8 = vsub.f32 1.0, %v394_v7 }
 0x9c8   :  { %v396_v11 = vmul.f32 %v1373_v6, %v395_v8 }
 0x9ca   :  { %v397_v12 = vadd.f32 %v1373_v6, %v396_v11 }
 0x9cc   :  { %v401_v15 = vsel %vm400_vm6, %v1373_v6, %v397_v12 }
 0x9cd   :  { %v406_v18 = vsel %vm403_vm7, %v405_v16, %v401_v15 }
 0x9ce   :  { %v412_v21 = vmul.f32 %v410_v20, %v406_v18 }
 0xa2b   :  { %v415_v17 = vpop.permute.xlu1 %414 }
 0xa2c   :  { %v417_v19 = vmul.f32 %v415_v17, %v406_v18 }
 0xa2e   :  { %419 = vrot.lane.b32.xlu2 %v417_v19, %s1518_s3 }
 0xa36   :  { %208 = vrot.lane.b32.xlu2 %v1616_v63, %s1518_s3 }
 0xa88   :  { %v420_v22 = vpop.permute.xlu2 %419 }
 0xa89   :  { %v1648_v23 = vadd.f32 %v420_v22, %v412_v21 }
 0xa8b   :  { %1374 = vtanh.f32 %v1648_v23  ;;  %v481_v17 = vrot.slane %v1648_v23, 6 }
 0xa90   :  { %v209_v24 = vpop.permute.xlu2 %208 }
 0xa91   :  { %v1375_v25 = vpop.eup %1374  ;;  %212 = vst.msk [vmem:[#allocation2] sm:$0xc] %vm211_vm8, %v209_v24 }
 0xa92   :  { %425 = vrot.lane.b32.xlu0 %v1375_v25, %s1517_s23 }
 0xa9a   :  { %283 = vrot.lane.b32.xlu0 %v1625_v30, %s1518_s3  ;;  %v1667_v30 = vld [vmem:[%s1858_s5 + $0x18] sm:$0xff] }
 0xa9b   :  { %714 = vmatpush.msra.mxu3 %v1667_v30  ;;  %777 = vmatpush.msra.mxu0 %v1667_v30 }
 0xa9c   :  { %847 = vmatpush.msrb.mxu1 %v1667_v30  ;;  %1123 = vmatpush.msrb.mxu2 %v1667_v30 }
 0xa9d   :  { %715 = vmatpush.msra.mxu3 %v1673_v31  ;;  %778 = vmatpush.msra.mxu0 %v1673_v31 }
 0xa9e   :  { %848 = vmatpush.msrb.mxu1 %v1673_v31  ;;  %1124 = vmatpush.msrb.mxu2 %v1673_v31 }
 0xa9f   :  { %716 = vmatpush.msra.mxu3 %v1681_v33  ;;  %779 = vmatpush.msra.mxu0 %v1681_v33 }
 0xaa0   :  { %849 = vmatpush.msrb.mxu1 %v1681_v33  ;;  %1125 = vmatpush.msrb.mxu2 %v1681_v33 }
 0xaa1   :  { %717 = vmatpush.msra.mxu3 %v1697_v35  ;;  %780 = vmatpush.msra.mxu0 %v1697_v35 }
 0xaa2   :  { %850 = vmatpush.msrb.mxu1 %v1697_v35  ;;  %1126 = vmatpush.msrb.mxu2 %v1697_v35 }
 0xb04   :  { %v426_v26 = vpop.permute.xlu0 %425 }
 0xb05   :  { %v428_v27 = vmul.f32 %v426_v26, %v406_v18 }
 0xb07   :  { %430 = vrot.lane.b32.xlu1 %v428_v27, %s1518_s3 }
 0xb0c   :  { %v284_v63 = vpop.permute.xlu0 %283 }
 0xb0d   :  { %287 = vst.msk [vmem:[#allocation2] sm:$0x30] %vm286_vm9, %v284_v63 }
 0xb0f   :  { %358 = vrot.lane.b32.xlu1 %v356_v57, %s1518_s3 }
 0xb79   :  { %v431_v36 = vpop.permute.xlu1 %430 }
 0xb7a   :  { %433 = vst.msk [vmem:[#allocation2 + $0x8] sm:$0x3] %vm139_vm5, %v431_v36  ;;  %1304 = vmatmul.msk.f32.vlgmr.msrb.gmra.mxu3 %vm44_vm0, %v431_v36 }
 0xb7b   :  { %917 = vmatpush.msrb.mxu3 %v1667_v30 }
 0xb7d   :  { %918 = vmatpush.msrb.mxu3 %v1673_v31 }
 0xb7f   :  { %919 = vmatpush.msrb.mxu3 %v1681_v33 }
 0xb81   :  { %v359_v37 = vpop.permute.xlu1 %358  ;;  %920 = vmatpush.msrb.mxu3 %v1697_v35 }
 0xb82   :  { %362 = vst.msk [vmem:[#allocation2] sm:$0xc0] %vm361_vm10, %v359_v37  ;;  %718 = vmatmul.f32.vlgmr.msra.gmra.mxu3 %v1516_v9  ;;  %v1724_v9 = vld [vmem:[%s1859_s6] ss:$0 sm:$0xff]  ;;  %s1519_s6 = smov 96  }
 0xb83   :  { %1193 = vmatpush.msra.mxu3 %v1667_v30 }
 0xb85   :  { %1194 = vmatpush.msra.mxu3 %v1673_v31 }
 0xb87   :  { %1195 = vmatpush.msra.mxu3 %v1681_v33 }
 0xb89   :  { %v659_v38 = vld [vmem:[#allocation2] sm:$0xff]  ;;  %1196 = vmatpush.msra.mxu3 %v1697_v35 }
 0xb8a   :  { %1310 = vmatmul.msk.f32.vlgmr.msra.gmra.mxu2 %vm44_vm0, %v659_v38 }
 0xbfd   :  { %v453_v39 = vpop.f32.mrf.mxu3 }
 0xbfe   :  { %v457_v40 = vrot.slane %v453_v39, 6 }
 0xc00   :  { %v459_v41 = vadd.f32 %v457_v40, %v1641_v62 }
 0xc02   :  { %1376 = vtanh.f32 %v459_v41  ;;  %v1305_v47 = vmul.f32 -1.442695, %v459_v41 }
 0xc05   :  { %v719_v44 = vpop.f32.mrf.mxu3 }
 0xc08   :  { %v1377_v42 = vpop.eup %1376 }
 0xc09   :  { %485 = vrot.lane.b32.xlu2 %v1377_v42, %s1517_s23 }
 0xc0d   :  { %v696_v43 = vpop.f32.mrf.mxu2 }
 0xc0e   :  { %v1727_v45 = vadd.f32 %v1724_v9, %v696_v43 }
 0xc10   :  { %v722_v46 = vadd.f32 %v719_v44, %v1727_v45 }
 0xc12   :  { %1378 = vtanh.f32 %v722_v46  ;;  %v1312_v56 = vmul.f32 -1.442695, %v722_v46 }
 0xc13   :  { %1380 = vpow2.f32 %v1305_v47 }
 0xc18   :  { %v1379_v13 = vpop.eup %1378 }
 0xc19   :  { %745 = vrot.lane.b32.xlu0 %v1379_v13, %s1517_s23  ;;  %v1381_v48 = vpop.eup %1380 }
 0xc1a   :  { %v463_v49 = vadd.f32 1.0, %v1381_v48 }
 0xc1c   :  { %1382 = vrcp.f32 %v463_v49  ;;  %v475_v55 = vand.u32 2147483648, %v463_v49  ;;  %vm469_vm11 = vweird.f32 %v463_v49  ;;  %v473_v57 = vand.u32 2147483647, %v463_v49 }
 0xc1d   :  { %1384 = vpow2.f32 %v1312_v56 }
 0xc1e   :  { %v476_v59 = vor.u32 1.1754944e-38, %v475_v55  ;;  %vm474_vm13 = vcmp.eq.f32.partialorder %v473_v57, 8.507059e+37 }
 0xc22   :  { %v1383_v50 = vpop.eup %1382 }
 0xc23   :  { %v465_v51 = vmul.f32 %v1383_v50, %v463_v49  ;;  %vm470_vm5 = vweird.f32 %v1383_v50  ;;  %v1385_v1 = vpop.eup %1384 }
 0xc24   :  { %vm471_vm12 = vmor %vm469_vm11, %vm470_vm5  ;;  %v726_v2 = vadd.f32 1.0, %v1385_v1 }
 0xc25   :  { %v466_v52 = vsub.f32 1.0, %v465_v51 }
 0xc26   :  { %1386 = vrcp.f32 %v726_v2  ;;  %v738_v8 = vand.u32 2147483648, %v726_v2  ;;  %vm732_vm15 = vweird.f32 %v726_v2  ;;  %v736_v11 = vand.u32 2147483647, %v726_v2 }
 0xc27   :  { %v467_v53 = vmul.f32 %v1383_v50, %v466_v52 }
 0xc28   :  { %v739_v10 = vor.u32 1.1754944e-38, %v738_v8  ;;  %vm737_vm2 = vcmp.eq.f32.partialorder %v736_v11, 8.507059e+37 }
 0xc29   :  { %v468_v54 = vadd.f32 %v1383_v50, %v467_v53 }
 0xc2b   :  { %v472_v58 = vsel %vm471_vm12, %v1383_v50, %v468_v54 }
 0xc2c   :  { %v477_v61 = vsel %vm474_vm13, %v476_v59, %v472_v58  ;;  %v1387_v3 = vpop.eup %1386 }
 0xc2d   :  { %v728_v4 = vmul.f32 %v1387_v3, %v726_v2  ;;  %vm733_vm14 = vweird.f32 %v1387_v3  ;;  %v483_v18 = vmul.f32 %v481_v17, %v477_v61 }
 0xc2e   :  { %vm734_vm1 = vmor %vm732_vm15, %vm733_vm14 }
 0xc2f   :  { %v729_v5 = vsub.f32 1.0, %v728_v4 }
 0xc31   :  { %v730_v6 = vmul.f32 %v1387_v3, %v729_v5 }
 0xc33   :  { %v731_v7 = vadd.f32 %v1387_v3, %v730_v6 }
 0xc35   :  { %v735_v12 = vsel %vm734_vm1, %v1387_v3, %v731_v7 }
 0xc36   :  { %v740_v15 = vsel %vm737_vm2, %v739_v10, %v735_v12 }
 0xc37   :  { %v743_v22 = vmul.f32 0.0, %v740_v15 }
 0xc63   :  { %v486_v60 = vpop.permute.xlu2 %485 }
 0xc64   :  { %v488_v0 = vmul.f32 %v486_v60, %v477_v61 }
 0xc66   :  { %490 = vrot.lane.b32.xlu1 %v488_v0, %s1518_s3 }
 0xc8b   :  { %v746_v14 = vpop.permute.xlu0 %745 }
 0xc8c   :  { %v748_v16 = vmul.f32 %v746_v14, %v740_v15 }
 0xc8e   :  { %750 = vrot.lane.b32.xlu2 %v748_v16, %s1518_s3 }
 0xcd8   :  { %v491_v19 = vpop.permute.xlu1 %490 }
 0xcd9   :  { %v1734_v20 = vadd.f32 %v491_v19, %v483_v18 }
 0xcdb   :  { %1388 = vtanh.f32 %v1734_v20  ;;  %v555_v14 = vrot.slane %v1734_v20, 6 }
 0xce1   :  { %v1389_v21 = vpop.eup %1388 }
 0xce2   :  { %496 = vrot.lane.b32.xlu0 %v1389_v21, %s1517_s23 }
 0xce8   :  { %v751_v24 = vpop.permute.xlu2 %750 }
 0xce9   :  { %v1738_v25 = vadd.f32 %v751_v24, %v743_v22 }
 0xceb   :  { %1390 = vtanh.f32 %v1738_v25  ;;  %v810_v19 = vrot.slane %v1738_v25, 6 }
 0xcf1   :  { %v1391_v26 = vpop.eup %1390 }
 0xcf2   :  { %756 = vrot.lane.b32.xlu1 %v1391_v26, %s1517_s23 }
 0xd54   :  { %v497_v27 = vpop.permute.xlu0 %496 }
 0xd55   :  { %v1742_v23 = vmul.f32 %v497_v27, %v477_v61 }
 0xd57   :  { %v505_v63 = vrot.slane %v1742_v23, 2 }
 0xd59   :  { %506 = vrot.lane.b32.xlu2 %v505_v63, %s1518_s3 }
 0xd64   :  { %v757_v28 = vpop.permute.xlu1 %756 }
 0xd65   :  { %v759_v29 = vmul.f32 %v757_v28, %v740_v15 }
 0xd67   :  { %761 = vrot.lane.b32.xlu0 %v759_v29, %s1518_s3 }
 0xdb3   :  { %v507_v32 = vpop.permute.xlu2 %506 }
 0xdb4   :  { %1306 = vmatmul.msk.f32.vlgmr.msrb.gmra.mxu0 %vm44_vm0, %v507_v32 }
 0xdb5   :  { %987 = vmatpush.msrb.mxu0 %v1667_v30 }
 0xdb7   :  { %988 = vmatpush.msrb.mxu0 %v1673_v31 }
 0xdb9   :  { %989 = vmatpush.msrb.mxu0 %v1681_v33 }
 0xdbb   :  { %990 = vmatpush.msrb.mxu0 %v1697_v35 }
 0xdd9   :  { %v762_v34 = vpop.permute.xlu0 %761 }
 0xdda   :  { %1313 = vmatmul.msk.f32.vlgmr.msra.gmra.mxu0 %vm44_vm0, %v762_v34 }
 0xe31   :  { %v527_v36 = vpop.f32.mrf.mxu0 }
 0xe32   :  { %v531_v37 = vrot.slane %v527_v36, 4 }
 0xe34   :  { %v533_v38 = vadd.f32 %v531_v37, %v1641_v62 }
 0xe36   :  { %1392 = vtanh.f32 %v533_v38  ;;  %v1307_v44 = vmul.f32 -1.442695, %v533_v38 }
 0xe3c   :  { %v1393_v39 = vpop.eup %1392 }
 0xe3d   :  { %559 = vrot.lane.b32.xlu1 %v1393_v39, %s1517_s23 }
 0xe57   :  { %v782_v40 = vpop.f32.mrf.mxu0 }
 0xe58   :  { %v786_v41 = vrot.slane %v782_v40, 6 }
 0xe5a   :  { %v788_v42 = vadd.f32 %v786_v41, %v1727_v45 }
 0xe5c   :  { %1394 = vtanh.f32 %v788_v42  ;;  %v1314_v47 = vmul.f32 -1.442695, %v788_v42 }
 0xe5d   :  { %1396 = vpow2.f32 %v1307_v44 }
 0xe62   :  { %v1395_v43 = vpop.eup %1394 }
 0xe63   :  { %814 = vrot.lane.b32.xlu2 %v1395_v43, %s1517_s23  ;;  %v1397_v46 = vpop.eup %1396 }
 0xe64   :  { %v537_v13 = vadd.f32 1.0, %v1397_v46 }
 0xe66   :  { %1398 = vrcp.f32 %v537_v13  ;;  %v549_v56 = vand.u32 2147483648, %v537_v13  ;;  %vm543_vm4 = vweird.f32 %v537_v13  ;;  %v547_v57 = vand.u32 2147483647, %v537_v13 }
 0xe67   :  { %1400 = vpow2.f32 %v1314_v47 }
 0xe68   :  { %v550_v60 = vor.u32 1.1754944e-38, %v549_v56  ;;  %vm548_vm7 = vcmp.eq.f32.partialorder %v547_v57, 8.507059e+37 }
 0xe6c   :  { %v1399_v48 = vpop.eup %1398 }
 0xe6d   :  { %v1401_v49 = vpop.eup %1400  ;;  %v539_v50 = vmul.f32 %v1399_v48, %v537_v13  ;;  %vm544_vm3 = vweird.f32 %v1399_v48 }
 0xe6e   :  { %v792_v51 = vadd.f32 1.0, %v1401_v49  ;;  %vm545_vm6 = vmor %vm543_vm4, %vm544_vm3 }
 0xe6f   :  { %v540_v52 = vsub.f32 1.0, %v539_v50 }
 0xe70   :  { %1402 = vrcp.f32 %v792_v51  ;;  %v804_v5 = vand.u32 2147483648, %v792_v51  ;;  %vm798_vm11 = vweird.f32 %v792_v51  ;;  %v802_v6 = vand.u32 2147483647, %v792_v51 }
 0xe71   :  { %v541_v53 = vmul.f32 %v1399_v48, %v540_v52 }
 0xe72   :  { %v805_v8 = vor.u32 1.1754944e-38, %v804_v5  ;;  %vm803_vm13 = vcmp.eq.f32.partialorder %v802_v6, 8.507059e+37 }
 0xe73   :  { %v542_v55 = vadd.f32 %v1399_v48, %v541_v53 }
 0xe75   :  { %v546_v59 = vsel %vm545_vm6, %v1399_v48, %v542_v55 }
 0xe76   :  { %v1403_v54 = vpop.eup %1402  ;;  %v551_v0 = vsel %vm548_vm7, %v550_v60, %v546_v59 }
 0xe77   :  { %v794_v58 = vmul.f32 %v1403_v54, %v792_v51  ;;  %vm799_vm5 = vweird.f32 %v1403_v54  ;;  %v557_v15 = vmul.f32 %v555_v14, %v551_v0 }
 0xe78   :  { %vm800_vm12 = vmor %vm798_vm11, %vm799_vm5 }
 0xe79   :  { %v795_v61 = vsub.f32 1.0, %v794_v58 }
 0xe7b   :  { %v796_v3 = vmul.f32 %v1403_v54, %v795_v61 }
 0xe7d   :  { %v797_v4 = vadd.f32 %v1403_v54, %v796_v3 }
 0xe7f   :  { %v801_v7 = vsel %vm800_vm12, %v1403_v54, %v797_v4 }
 0xe80   :  { %v806_v12 = vsel %vm803_vm13, %v805_v8, %v801_v7 }
 0xe81   :  { %v812_v21 = vmul.f32 %v810_v19, %v806_v12 }
 0xeaf   :  { %v560_v1 = vpop.permute.xlu1 %559 }
 0xeb0   :  { %v562_v2 = vmul.f32 %v560_v1, %v551_v0 }
 0xeb2   :  { %564 = vrot.lane.b32.xlu0 %v562_v2, %s1518_s3 }
 0xebd   :  { %v815_v11 = vpop.permute.xlu2 %814 }
 0xebe   :  { %v817_v10 = vmul.f32 %v815_v11, %v806_v12 }
 0xec0   :  { %819 = vrot.lane.b32.xlu1 %v817_v10, %s1518_s3 }
 0xf24   :  { %v565_v16 = vpop.permute.xlu0 %564 }
 0xf25   :  { %v1760_v17 = vadd.f32 %v565_v16, %v557_v15 }
 0xf27   :  { %1404 = vtanh.f32 %v1760_v17 }
 0xf2d   :  { %v1405_v18 = vpop.eup %1404 }
 0xf2e   :  { %570 = vrot.lane.b32.xlu2 %v1405_v18, %s1517_s23 }
 0xf32   :  { %v820_v22 = vpop.permute.xlu1 %819 }
 0xf33   :  { %v822_v24 = vadd.f32 %v820_v22, %v812_v21 }
 0xf35   :  { %1406 = vtanh.f32 %v822_v24  ;;  %v880_v55 = vrot.slane %v822_v24, 6  ;;  %v629_v24 = vrot.slane %v1760_v17, 6 }
 0xf3b   :  { %v1407_v26 = vpop.eup %1406 }
 0xf3c   :  { %825 = vrot.lane.b32.xlu0 %v1407_v26, %s1517_s23 }
 0xf88   :  { %v571_v27 = vpop.permute.xlu2 %570 }
 0xf89   :  { %v1766_v20 = vmul.f32 %v571_v27, %v551_v0 }
 0xf8b   :  { %v579_v63 = vrot.slane %v1766_v20, 4 }
 0xf8d   :  { %580 = vrot.lane.b32.xlu1 %v579_v63, %s1518_s3 }
 0xfae   :  { %v826_v28 = vpop.permute.xlu0 %825 }
 0xfaf   :  { %v828_v29 = vmul.f32 %v826_v28, %v806_v12 }
 0xfb1   :  { %v830_v32 = vrot.slane %v828_v29, 2 }
 0xfb3   :  { %831 = vrot.lane.b32.xlu2 %v830_v32, %s1518_s3 }
 0xfff   :  { %v581_v25 = vpop.permute.xlu1 %580 }
0x1000   :  { %1308 = vmatmul.msk.f32.vlgmr.msra.gmra.mxu1 %vm44_vm0, %v581_v25 }
0x1001   :  { %1053 = vmatpush.msra.mxu1 %v1667_v30 }
0x1003   :  { %1054 = vmatpush.msra.mxu1 %v1673_v31 }
0x1005   :  { %1055 = vmatpush.msra.mxu1 %v1681_v33 }
0x1007   :  { %1056 = vmatpush.msra.mxu1 %v1697_v35 }
0x100d   :  { %v832_v34 = vpop.permute.xlu2 %831 }
0x100e   :  { %1315 = vmatmul.msk.f32.vlgmr.msrb.gmra.mxu1 %vm44_vm0, %v832_v34 }
0x107d   :  { %v601_v36 = vpop.f32.mrf.mxu1 }
0x107e   :  { %v605_v47 = vrot.slane %v601_v36, 2 }
0x1080   :  { %v607_v50 = vadd.f32 %v605_v47, %v1641_v62 }
0x1082   :  { %v1309_v62 = vmul.f32 -1.442695, %v607_v50 }
0x108b   :  { %v852_v37 = vpop.f32.mrf.mxu1 }
0x108c   :  { %v856_v38 = vrot.slane %v852_v37, 4 }
0x108e   :  { %v858_v39 = vadd.f32 %v856_v38, %v1727_v45 }
0x1090   :  { %1408 = vtanh.f32 %v858_v39  ;;  %v1316_v41 = vmul.f32 -1.442695, %v858_v39 }
0x1092   :  { %1410 = vpow2.f32 %v1316_v41 }
0x1096   :  { %v1409_v40 = vpop.eup %1408 }
0x1097   :  { %884 = vrot.lane.b32.xlu0 %v1409_v40, %s1517_s23 }
0x1098   :  { %v1411_v30 = vpop.eup %1410 }
0x1099   :  { %v862_v31 = vadd.f32 1.0, %v1411_v30 }
0x109b   :  { %1412 = vrcp.f32 %v862_v31  ;;  %v874_v46 = vand.u32 2147483648, %v862_v31  ;;  %vm868_vm15 = vweird.f32 %v862_v31  ;;  %v872_v13 = vand.u32 2147483647, %v862_v31 }
0x109c   :  { %1414 = vtanh.f32 %v607_v50 }
0x109d   :  { %v875_v49 = vor.u32 1.1754944e-38, %v874_v46  ;;  %vm873_vm2 = vcmp.eq.f32.partialorder %v872_v13, 8.507059e+37 }
0x10a1   :  { %v1413_v33 = vpop.eup %1412 }
0x10a2   :  { %v864_v42 = vmul.f32 %v1413_v33, %v862_v31  ;;  %vm869_vm14 = vweird.f32 %v1413_v33  ;;  %v1415_v54 = vpop.eup %1414 }
0x10a3   :  { %vm870_vm1 = vmor %vm868_vm15, %vm869_vm14 }
0x10a4   :  { %v865_v35 = vsub.f32 1.0, %v864_v42 }
0x10a6   :  { %v866_v43 = vmul.f32 %v1413_v33, %v865_v35 }
0x10a8   :  { %v867_v44 = vadd.f32 %v1413_v33, %v866_v43 }
0x10aa   :  { %v871_v48 = vsel %vm870_vm1, %v1413_v33, %v867_v44 }
0x10ab   :  { %v876_v52 = vsel %vm873_vm2, %v875_v49, %v871_v48 }
0x10ac   :  { %v882_v56 = vmul.f32 %v880_v55, %v876_v52 }
0x1109   :  { %v885_v51 = vpop.permute.xlu0 %884 }
0x110a   :  { %v887_v53 = vmul.f32 %v885_v51, %v876_v52 }
0x110c   :  { %889 = vrot.lane.b32.xlu1 %v887_v53, %s1518_s3 }
0x1114   :  { %633 = vrot.lane.b32.xlu1 %v1415_v54, %s1517_s23 }
0x117e   :  { %v890_v57 = vpop.permute.xlu1 %889 }
0x117f   :  { %v1782_v58 = vadd.f32 %v890_v57, %v882_v56 }
0x1181   :  { %1416 = vtanh.f32 %v1782_v58  ;;  %v950_v43 = vrot.slane %v1782_v58, 6 }
0x1182   :  { %1418 = vpow2.f32 %v1309_v62 }
0x1186   :  { %v634_v10 = vpop.permute.xlu1 %633 }
0x1187   :  { %v1417_v59 = vpop.eup %1416 }
0x1188   :  { %895 = vrot.lane.b32.xlu2 %v1417_v59, %s1517_s23  ;;  %v1419_v60 = vpop.eup %1418 }
0x1189   :  { %v611_v61 = vadd.f32 1.0, %v1419_v60 }
0x118b   :  { %1420 = vrcp.f32 %v611_v61  ;;  %v623_v8 = vand.u32 2147483648, %v611_v61  ;;  %vm617_vm4 = vweird.f32 %v611_v61  ;;  %v621_v11 = vand.u32 2147483647, %v611_v61 }
0x118d   :  { %v624_v14 = vor.u32 1.1754944e-38, %v623_v8  ;;  %vm622_vm7 = vcmp.eq.f32.partialorder %v621_v11, 8.507059e+37 }
0x1191   :  { %v1421_v0 = vpop.eup %1420 }
0x1192   :  { %v613_v1 = vmul.f32 %v1421_v0, %v611_v61  ;;  %vm618_vm3 = vweird.f32 %v1421_v0 }
0x1193   :  { %vm619_vm6 = vmor %vm617_vm4, %vm618_vm3 }
0x1194   :  { %v614_v2 = vsub.f32 1.0, %v613_v1 }
0x1196   :  { %v615_v3 = vmul.f32 %v1421_v0, %v614_v2 }
0x1198   :  { %v616_v6 = vadd.f32 %v1421_v0, %v615_v3 }
0x119a   :  { %v620_v12 = vsel %vm619_vm6, %v1421_v0, %v616_v6 }
0x119b   :  { %v625_v15 = vsel %vm622_vm7, %v624_v14, %v620_v12 }
0x119c   :  { %v636_v16 = vmul.f32 %v634_v10, %v625_v15  ;;  %v631_v27 = vmul.f32 %v629_v24, %v625_v15 }
0x11e2   :  { %v896_v4 = vpop.permute.xlu2 %895 }
0x11e3   :  { %v898_v5 = vmul.f32 %v896_v4, %v876_v52 }
0x11e5   :  { %v900_v7 = vrot.slane %v898_v5, 4 }
0x11e7   :  { %901 = vrot.lane.b32.xlu0 %v900_v7, %s1518_s3 }
0x11ef   :  { %638 = vrot.lane.b32.xlu0 %v636_v16, %s1518_s3 }
0x1259   :  { %v902_v18 = vpop.permute.xlu0 %901 }
0x125a   :  { %1317 = vmatmul.msk.f32.vlgmr.msrb.gmra.mxu3 %vm44_vm0, %v902_v18 }
0x1261   :  { %v639_v26 = vpop.permute.xlu0 %638 }
0x1262   :  { %v1791_v63 = vadd.f32 %v639_v26, %v631_v27 }
0x12dd   :  { %v922_v19 = vpop.f32.mrf.mxu3 }
0x12de   :  { %v926_v21 = vrot.slane %v922_v19, 2 }
0x12e0   :  { %v928_v22 = vadd.f32 %v926_v21, %v1727_v45 }
0x12e2   :  { %1422 = vtanh.f32 %v928_v22  ;;  %v1318_v32 = vmul.f32 -1.442695, %v928_v22 }
0x12e3   :  { %1424 = vtanh.f32 %v1791_v63 }
0x12e4   :  { %1426 = vpow2.f32 %v1318_v32 }
0x12e8   :  { %v1423_v28 = vpop.eup %1422 }
0x12e9   :  { %954 = vrot.lane.b32.xlu2 %v1423_v28, %s1517_s23  ;;  %v1425_v29 = vpop.eup %1424 }
0x12ea   :  { %v1427_v45 = vpop.eup %1426 }
0x12eb   :  { %v932_v17 = vadd.f32 1.0, %v1427_v45 }
0x12ed   :  { %1428 = vrcp.f32 %v932_v17  ;;  %v944_v39 = vand.u32 2147483648, %v932_v17  ;;  %vm938_vm11 = vweird.f32 %v932_v17  ;;  %v942_v40 = vand.u32 2147483647, %v932_v17 }
0x12ef   :  { %v945_v30 = vor.u32 1.1754944e-38, %v944_v39  ;;  %vm943_vm13 = vcmp.eq.f32.partialorder %v942_v40, 8.507059e+37 }
0x12f1   :  { %644 = vrot.lane.b32.xlu2 %v1425_v29, %s1517_s23 }
0x12f3   :  { %v1429_v25 = vpop.eup %1428 }
0x12f4   :  { %v934_v34 = vmul.f32 %v1429_v25, %v932_v17  ;;  %vm939_vm5 = vweird.f32 %v1429_v25 }
0x12f5   :  { %vm940_vm12 = vmor %vm938_vm11, %vm939_vm5 }
0x12f6   :  { %v935_v36 = vsub.f32 1.0, %v934_v34 }
0x12f8   :  { %v936_v37 = vmul.f32 %v1429_v25, %v935_v36 }
0x12f9   :  { %575 = vrot.lane.b32.xlu2 %v1766_v20, %s1518_s3 }
0x12fa   :  { %v937_v38 = vadd.f32 %v1429_v25, %v936_v37 }
0x12fc   :  { %v941_v41 = vsel %vm940_vm12, %v1429_v25, %v937_v38 }
0x12fd   :  { %v946_v20 = vsel %vm943_vm13, %v945_v30, %v941_v41 }
0x12fe   :  { %v952_v44 = vmul.f32 %v950_v43, %v946_v20 }
0x1343   :  { %v955_v31 = vpop.permute.xlu2 %954 }
0x1344   :  { %v957_v33 = vmul.f32 %v955_v31, %v946_v20 }
0x1346   :  { %959 = vrot.lane.b32.xlu1 %v957_v33, %s1518_s3 }
0x134b   :  { %v645_v42 = vpop.permute.xlu2 %644 }
0x134c   :  { %v647_v49 = vmul.f32 %v645_v42, %v625_v15 }
0x134e   :  { %501 = vrot.lane.b32.xlu1 %v1742_v23, %s1518_s3 }
0x1353   :  { %v576_v35 = vpop.permute.xlu2 %575 }
0x1354   :  { %578 = vst.msk [vmem:[#allocation2 + $0x8] sm:$0x30] %vm286_vm9, %v576_v35 }
0x13b8   :  { %v960_v46 = vpop.permute.xlu1 %959 }
0x13b9   :  { %v962_v13 = vadd.f32 %v960_v46, %v952_v44 }
0x13bb   :  { %1430 = vtanh.f32 %v962_v13  ;;  %v1017_v10 = vrot.slane %v962_v13, 6 }
0x13c0   :  { %v502_v47 = vpop.permute.xlu1 %501 }
0x13c1   :  { %v1431_v48 = vpop.eup %1430  ;;  %504 = vst.msk [vmem:[#allocation2 + $0x8] sm:$0xc] %vm211_vm8, %v502_v47 }
0x13c2   :  { %965 = vrot.lane.b32.xlu0 %v1431_v48, %s1517_s23 }
0x13ca   :  { %649 = vrot.lane.b32.xlu0 %v647_v49, %s1518_s3 }
0x1434   :  { %v966_v50 = vpop.permute.xlu0 %965 }
0x1435   :  { %v968_v23 = vmul.f32 %v966_v50, %v946_v20 }
0x1437   :  { %v970_v51 = vrot.slane %v968_v23, 6 }
0x1439   :  { %971 = vrot.lane.b32.xlu1 %v970_v51, %s1518_s3 }
0x143c   :  { %v650_v52 = vpop.permute.xlu0 %649 }
0x143d   :  { %652 = vst.msk [vmem:[#allocation2 + $0x8] sm:$0xc0] %vm361_vm10, %v650_v52 }
0x143e   :  { %653 = vst.msk [vmem:[#allocation3 - $0x6] sm:$0xc0] %vm361_vm10, %v650_v52 }
0x1444   :  { %v660_v53 = vld [vmem:[#allocation2 + $0x8] sm:$0xff] }
0x1445   :  { %1311 = vmatmul.msk.f32.gmra.mxu2 %vm44_vm0, %v660_v53 }
0x14ab   :  { %v972_v54 = vpop.permute.xlu1 %971 }
0x14ac   :  { %1319 = vmatmul.msk.f32.vlgmr.msrb.gmra.mxu0 %vm44_vm0, %v972_v54 }
0x14c8   :  { %v699_v55 = vpop.f32.mrf.mxu2 }
0x14c9   :  { %v1812_v56 = vadd.f32 %v1724_v9, %v699_v55 }
0x1529   :  { %v992_v57 = vpop.f32.mrf.mxu0 }
0x152a   :  { %v995_v58 = vadd.f32 %v992_v57, %v1812_v56 }
0x152c   :  { %1432 = vtanh.f32 %v995_v58  ;;  %v1320_v62 = vmul.f32 -1.442695, %v995_v58 }
0x152e   :  { %1434 = vpow2.f32 %v1320_v62 }
0x1532   :  { %v1433_v59 = vpop.eup %1432 }
0x1533   :  { %1021 = vrot.lane.b32.xlu2 %v1433_v59, %s1517_s23 }
0x1534   :  { %v1435_v60 = vpop.eup %1434 }
0x1535   :  { %v999_v61 = vadd.f32 1.0, %v1435_v60 }
0x1537   :  { %1436 = vrcp.f32 %v999_v61  ;;  %v1011_v9 = vand.u32 2147483648, %v999_v61  ;;  %vm1005_vm9 = vweird.f32 %v999_v61  ;;  %v1009_v5 = vand.u32 2147483647, %v999_v61 }
0x1539   :  { %v1012_v7 = vor.u32 1.1754944e-38, %v1011_v9  ;;  %vm1010_vm15 = vcmp.eq.f32.partialorder %v1009_v5, 8.507059e+37 }
0x153d   :  { %v1437_v0 = vpop.eup %1436 }
0x153e   :  { %v1001_v1 = vmul.f32 %v1437_v0, %v999_v61  ;;  %vm1006_vm8 = vweird.f32 %v1437_v0 }
0x153f   :  { %vm1007_vm14 = vmor %vm1005_vm9, %vm1006_vm8 }
0x1540   :  { %v1002_v2 = vsub.f32 1.0, %v1001_v1 }
0x1542   :  { %v1003_v3 = vmul.f32 %v1437_v0, %v1002_v2 }
0x1544   :  { %v1004_v4 = vadd.f32 %v1437_v0, %v1003_v3 }
0x1546   :  { %v1008_v6 = vsel %vm1007_vm14, %v1437_v0, %v1004_v4 }
0x1547   :  { %v1013_v11 = vsel %vm1010_vm15, %v1012_v7, %v1008_v6 }
0x1548   :  { %v1019_v14 = vmul.f32 %v1017_v10, %v1013_v11 }
0x158d   :  { %v1022_v8 = vpop.permute.xlu2 %1021 }
0x158e   :  { %v1024_v12 = vmul.f32 %v1022_v8, %v1013_v11 }
0x1590   :  { %1026 = vrot.lane.b32.xlu0 %v1024_v12, %s1518_s3 }
0x1602   :  { %v1027_v15 = vpop.permute.xlu0 %1026 }
0x1603   :  { %v1029_v16 = vadd.f32 %v1027_v15, %v1019_v14 }
0x1605   :  { %1438 = vtanh.f32 %v1029_v16  ;;  %v1086_v33 = vrot.slane %v1029_v16, 6 }
0x160b   :  { %v1439_v18 = vpop.eup %1438 }
0x160c   :  { %1032 = vrot.lane.b32.xlu1 %v1439_v18, %s1517_s23 }
0x167e   :  { %v1033_v19 = vpop.permute.xlu1 %1032 }
0x167f   :  { %v1035_v21 = vmul.f32 %v1033_v19, %v1013_v11 }
0x1681   :  { %1037 = vrot.lane.b32.xlu2 %v1035_v21, %s1518_s3 }
0x16db   :  { %v1038_v22 = vpop.permute.xlu2 %1037 }
0x16dc   :  { %1321 = vmatmul.msk.f32.vlgmr.msra.gmra.mxu1 %vm44_vm0, %v1038_v22 }
0x1759   :  { %v1058_v24 = vpop.f32.mrf.mxu1 }
0x175a   :  { %v1062_v26 = vrot.slane %v1058_v24, 6 }
0x175c   :  { %v1064_v27 = vadd.f32 %v1062_v26, %v1812_v56 }
0x175e   :  { %1440 = vtanh.f32 %v1064_v27  ;;  %v1322_v29 = vmul.f32 -1.442695, %v1064_v27 }
0x1760   :  { %1442 = vpow2.f32 %v1322_v29 }
0x1764   :  { %v1441_v28 = vpop.eup %1440 }
0x1765   :  { %1090 = vrot.lane.b32.xlu0 %v1441_v28, %s1517_s23 }
0x1766   :  { %v1443_v32 = vpop.eup %1442 }
0x1767   :  { %v1068_v45 = vadd.f32 1.0, %v1443_v32 }
0x1769   :  { %1444 = vrcp.f32 %v1068_v45  ;;  %v1080_v38 = vand.u32 2147483648, %v1068_v45  ;;  %vm1074_vm2 = vweird.f32 %v1068_v45  ;;  %v1078_v39 = vand.u32 2147483647, %v1068_v45 }
0x176b   :  { %v1081_v41 = vor.u32 1.1754944e-38, %v1080_v38  ;;  %vm1079_vm4 = vcmp.eq.f32.partialorder %v1078_v39, 8.507059e+37 }
0x176f   :  { %v1445_v17 = vpop.eup %1444 }
0x1770   :  { %v1070_v25 = vmul.f32 %v1445_v17, %v1068_v45  ;;  %vm1075_vm1 = vweird.f32 %v1445_v17 }
0x1771   :  { %vm1076_vm3 = vmor %vm1074_vm2, %vm1075_vm1 }
0x1772   :  { %v1071_v34 = vsub.f32 1.0, %v1070_v25 }
0x1774   :  { %v1072_v36 = vmul.f32 %v1445_v17, %v1071_v34 }
0x1776   :  { %v1073_v37 = vadd.f32 %v1445_v17, %v1072_v36 }
0x1778   :  { %v1077_v40 = vsel %vm1076_vm3, %v1445_v17, %v1073_v37 }
0x1779   :  { %v1082_v31 = vsel %vm1079_vm4, %v1081_v41, %v1077_v40 }
0x177a   :  { %v1088_v42 = vmul.f32 %v1086_v33, %v1082_v31 }
0x17d7   :  { %v1091_v30 = vpop.permute.xlu0 %1090 }
0x17d8   :  { %v1093_v20 = vmul.f32 %v1091_v30, %v1082_v31 }
0x17da   :  { %1095 = vrot.lane.b32.xlu1 %v1093_v20, %s1518_s3 }
0x184c   :  { %v1096_v35 = vpop.permute.xlu1 %1095 }
0x184d   :  { %v1098_v43 = vadd.f32 %v1096_v35, %v1088_v42 }
0x184f   :  { %1446 = vtanh.f32 %v1098_v43  ;;  %v1156_v9 = vrot.slane %v1098_v43, 6 }
0x1855   :  { %v1447_v44 = vpop.eup %1446 }
0x1856   :  { %1101 = vrot.lane.b32.xlu2 %v1447_v44, %s1517_s23 }
0x18b0   :  { %v1102_v46 = vpop.permute.xlu2 %1101 }
0x18b1   :  { %v1104_v13 = vmul.f32 %v1102_v46, %v1082_v31 }
0x18b3   :  { %v1106_v47 = vrot.slane %v1104_v13, 2 }
0x18b5   :  { %1107 = vrot.lane.b32.xlu0 %v1106_v47, %s1518_s3 }
0x1927   :  { %v1108_v48 = vpop.permute.xlu0 %1107 }
0x1928   :  { %1323 = vmatmul.msk.f32.vlgmr.msrb.gmra.mxu2 %vm44_vm0, %v1108_v48 }
0x19ab   :  { %v1128_v49 = vpop.f32.mrf.mxu2 }
0x19ac   :  { %v1132_v50 = vrot.slane %v1128_v49, 4 }
0x19ae   :  { %v1134_v23 = vadd.f32 %v1132_v50, %v1812_v56 }
0x19b0   :  { %1448 = vtanh.f32 %v1134_v23  ;;  %v1324_v52 = vmul.f32 -1.442695, %v1134_v23 }
0x19b2   :  { %1450 = vpow2.f32 %v1324_v52 }
0x19b6   :  { %v1449_v51 = vpop.eup %1448 }
0x19b7   :  { %1160 = vrot.lane.b32.xlu1 %v1449_v51, %s1517_s23 }
0x19b8   :  { %v1451_v53 = vpop.eup %1450 }
0x19b9   :  { %v1138_v54 = vadd.f32 1.0, %v1451_v53 }
0x19bb   :  { %1452 = vrcp.f32 %v1138_v54  ;;  %v1150_v60 = vand.u32 2147483648, %v1138_v54  ;;  %vm1144_vm7 = vweird.f32 %v1138_v54  ;;  %v1148_v61 = vand.u32 2147483647, %v1138_v54 }
0x19bd   :  { %v1151_v1 = vor.u32 1.1754944e-38, %v1150_v60  ;;  %vm1149_vm11 = vcmp.eq.f32.partialorder %v1148_v61, 8.507059e+37 }
0x19c1   :  { %v1453_v55 = vpop.eup %1452 }
0x19c2   :  { %v1140_v57 = vmul.f32 %v1453_v55, %v1138_v54  ;;  %vm1145_vm6 = vweird.f32 %v1453_v55 }
0x19c3   :  { %vm1146_vm5 = vmor %vm1144_vm7, %vm1145_vm6 }
0x19c4   :  { %v1141_v58 = vsub.f32 1.0, %v1140_v57 }
0x19c6   :  { %v1142_v59 = vmul.f32 %v1453_v55, %v1141_v58 }
0x19c8   :  { %v1143_v62 = vadd.f32 %v1453_v55, %v1142_v59 }
0x19ca   :  { %v1147_v0 = vsel %vm1146_vm5, %v1453_v55, %v1143_v62 }
0x19cb   :  { %v1152_v3 = vsel %vm1149_vm11, %v1151_v1, %v1147_v0 }
0x19cc   :  { %v1158_v5 = vmul.f32 %v1156_v9, %v1152_v3 }
0x1a29   :  { %v1161_v2 = vpop.permute.xlu1 %1160 }
0x1a2a   :  { %v1163_v4 = vmul.f32 %v1161_v2, %v1152_v3 }
0x1a2c   :  { %1165 = vrot.lane.b32.xlu2 %v1163_v4, %s1518_s3 }
0x1a86   :  { %v1166_v6 = vpop.permute.xlu2 %1165 }
0x1a87   :  { %v1168_v7 = vadd.f32 %v1166_v6, %v1158_v5 }
0x1a89   :  { %1454 = vtanh.f32 %v1168_v7  ;;  %v1226_v38 = vrot.slane %v1168_v7, 6 }
0x1a8f   :  { %v1455_v8 = vpop.eup %1454 }
0x1a90   :  { %1171 = vrot.lane.b32.xlu0 %v1455_v8, %s1517_s23 }
0x1b02   :  { %v1172_v11 = vpop.permute.xlu0 %1171 }
0x1b03   :  { %v1174_v12 = vmul.f32 %v1172_v11, %v1152_v3 }
0x1b05   :  { %v1176_v10 = vrot.slane %v1174_v12, 4 }
0x1b07   :  { %1177 = vrot.lane.b32.xlu1 %v1176_v10, %s1518_s3 }
0x1b79   :  { %v1178_v14 = vpop.permute.xlu1 %1177 }
0x1b7a   :  { %1325 = vmatmul.msk.f32.vlgmr.msra.gmra.mxu3 %vm44_vm0, %v1178_v14 }
0x1bfd   :  { %v1198_v15 = vpop.f32.mrf.mxu3 }
0x1bfe   :  { %v1202_v16 = vrot.slane %v1198_v15, 2 }
0x1c00   :  { %v1204_v18 = vadd.f32 %v1202_v16, %v1812_v56 }
0x1c02   :  { %1456 = vtanh.f32 %v1204_v18  ;;  %v1326_v21 = vmul.f32 -1.442695, %v1204_v18 }
0x1c04   :  { %1458 = vpow2.f32 %v1326_v21 }
0x1c08   :  { %v1457_v19 = vpop.eup %1456 }
0x1c09   :  { %1230 = vrot.lane.b32.xlu2 %v1457_v19, %s1517_s23 }
0x1c0a   :  { %v1459_v22 = vpop.eup %1458 }
0x1c0b   :  { %v1208_v24 = vadd.f32 1.0, %v1459_v22 }
0x1c0d   :  { %1460 = vrcp.f32 %v1208_v24  ;;  %v1220_v56 = vand.u32 2147483648, %v1208_v24  ;;  %vm1214_vm12 = vweird.f32 %v1208_v24  ;;  %v1218_v45 = vand.u32 2147483647, %v1208_v24 }
0x1c0f   :  { %v1221_v25 = vor.u32 1.1754944e-38, %v1220_v56  ;;  %vm1219_vm8 = vcmp.eq.f32.partialorder %v1218_v45, 8.507059e+37 }
0x1c11   :  { %655 = vrot.lane.b32.xlu2 %v1791_v63, %s1519_s6 }
0x1c13   :  { %v1461_v26 = vpop.eup %1460 }
0x1c14   :  { %v1210_v27 = vmul.f32 %v1461_v26, %v1208_v24  ;;  %vm1215_vm0 = vweird.f32 %v1461_v26 }
0x1c15   :  { %vm1216_vm13 = vmor %vm1214_vm12, %vm1215_vm0 }
0x1c16   :  { %v1211_v28 = vsub.f32 1.0, %v1210_v27 }
0x1c18   :  { %v1212_v29 = vmul.f32 %v1461_v26, %v1211_v28 }
0x1c1a   :  { %v1213_v32 = vadd.f32 %v1461_v26, %v1212_v29 }
0x1c1c   :  { %v1217_v17 = vsel %vm1216_vm13, %v1461_v26, %v1213_v32 }
0x1c1d   :  { %v1222_v63 = vsel %vm1219_vm8, %v1221_v25, %v1217_v17 }
0x1c1e   :  { %v1228_v39 = vmul.f32 %v1226_v38, %v1222_v63 }
0x1c63   :  { %v1231_v34 = vpop.permute.xlu2 %1230 }
0x1c64   :  { %v1233_v36 = vmul.f32 %v1231_v34, %v1222_v63 }
0x1c66   :  { %1235 = vrot.lane.b32.xlu0 %v1233_v36, %s1518_s3 }
0x1c6b   :  { %v656_v37 = vpop.permute.xlu2 %655 }
0x1c6c   :  { %658 = vst.msk [vmem:[#allocation5 - $0x6] sm:$0xc0] %vm361_vm10, %v656_v37 }
0x1cd8   :  { %v1236_v40 = vpop.permute.xlu0 %1235 }
0x1cd9   :  { %v1238_v41 = vadd.f32 %v1236_v40, %v1228_v39 }
0x1cdb   :  { %1462 = vtanh.f32 %v1238_v41 }
0x1ce1   :  { %v1463_v30 = vpop.eup %1462 }
0x1ce2   :  { %1241 = vrot.lane.b32.xlu1 %v1463_v30, %s1517_s23  ;;  %s1522_s23 = smov [#allocation3]  }
0x1ce3   :  { %s1261_s24 = sshll.u32 %s1522_s23, 4  ;;  %s1262_s24 = int_to_ptr.vmem [resolvable:$true] %s1261_s24 }
0x1cea   :  { %1252 = vrot.lane.b32.xlu1 %v1238_v41, %s1519_s6 }
0x1d54   :  { %v1242_v31 = vpop.permute.xlu1 %1241 }
0x1d55   :  { %v1244_v20 = vmul.f32 %v1242_v31, %v1222_v63 }
0x1d57   :  { %1246 = vrot.lane.b32.xlu0 %v1244_v20, %s1518_s3 }
0x1d5c   :  { %v1253_v33 = vpop.permute.xlu1 %1252 }
0x1d5d   :  { %1256 = vst.msk [vmem:[#allocation5 - $0x4] sm:$0xc0] %vm361_vm10, %v1253_v33 }
0x1d5e   :  { %1282 = dma.vmem_to_hbm [thread:$0]  %s1275_s20, 64, %s1277_s1, [#allocation6], %s1518_s3, %s1518_s3, %s1521_s2  }
0x1dc9   :  { %v1247_v42 = vpop.permute.xlu0 %1246 }
0x1dca   :  { %1250 = vst.msk [vmem:[#allocation3 - $0x4] sm:$0xc0] %vm361_vm10, %v1247_v42 }
0x1dcb   :  { %1269 = dma.vmem_to_hbm [thread:$0]  %s1262_s24, 64, %s1264_s26, [#allocation4], %s1518_s3, %s1518_s3, %s1521_s2  }
0x1dcc   :  { %1512 = dma.done.wait [#allocation4], 64  }
0x1dcd   :  { %1513 = vsyncadd [#allocation4], 4294967232 }
0x1dce   :  { %1514 = dma.done.wait [#allocation6], 64  }
0x1dcf   :  { %1515 = vsyncadd [#allocation6], 4294967232 }
0x1dd0   :  { %1291 = vsyncpa [#allocation4], 1 }
0x1dd1   :  { %1292 = vsyncpa [#allocation6], 1 }

</bundles_post_ra>
